<compile_context>
chip_gen: v7x
topology: tpu7x:2x2x1
jax: 0.10.0
libtpu: 0.0.40
codegen_flags: <defaults>
</compile_context>

<pallas_src>
import jax
import jax.numpy as jnp
from jax.experimental import pallas as pl
from jax.experimental.pallas import tpu as pltpu


HIDDEN = 200
HIDDEN_PAD = 256   # 200 padded up to 256 for clean lane / MXU alignment


def _mlp_kernel(x_ref,
                w0_ref, b0_ref,
                w1_ref, b1_ref,
                w2_ref, b2_ref,
                w3_ref, b3_ref,
                w4_ref, b4_ref,
                o_ref):
    # Transposed activation layout: (features, batch) -> batch in lanes.
    x = x_ref[...]                                        # (1, tile) f32

    # Layer 0 has K == 1: outer-product broadcast on the VPU, MXU stays free.
    h = w0_ref[...] * x + b0_ref[...]                     # (H, tile) f32
    h = jnp.maximum(h, 0.0)

    # Layers 1..3: (H, H) @ (H, tile) on the MXU with fp32 accumulation.
    for w_ref, b_ref in ((w1_ref, b1_ref), (w2_ref, b2_ref), (w3_ref, b3_ref)):
        h = jnp.dot(w_ref[...], h.astype(w_ref.dtype),
                    preferred_element_type=jnp.float32) + b_ref[...]
        h = jnp.maximum(h, 0.0)

    # Final layer maps H -> 1: VPU multiply + XLU sublane reduce keeps the
    # output a lane-dense (1, tile) slab and frees the MXU slot.
    out = jnp.sum(h * w4_ref[...], axis=0, keepdims=True) + b4_ref[...]
    o_ref[...] = out.astype(o_ref.dtype)


def _prepare_params(params, compute_dtype):
    """Pad 200 -> 256 and lay weights out for the (features, batch) kernel.

    `params` is PyTorch layout: [(W (out, in), b (out,))] * 5.
    Returns flat list [w0, b0, ..., w4_col, b4] for pallas_call.
    """
    (w0, b0), (w1, b1), (w2, b2), (w3, b3), (w4, b4) = params
    H, P = HIDDEN, HIDDEN_PAD

    def pad(a, shape):
        out = jnp.zeros(shape, a.dtype)
        return out.at[tuple(slice(0, s) for s in a.shape)].set(a)

    flat = [pad(w0, (P, 1)).astype(compute_dtype),          # (P, 1)
            pad(b0.reshape(H, 1), (P, 1))]                  # (P, 1) f32 bias
    for w, b in ((w1, b1), (w2, b2), (w3, b3)):
        flat.append(pad(w, (P, P)).astype(compute_dtype))   # (P, P)
        flat.append(pad(b.reshape(H, 1), (P, 1)))           # (P, 1) f32 bias
    flat.append(pad(w4.reshape(1, H).T, (P, 1)).astype(compute_dtype))  # (P, 1) column
    flat.append(b4.reshape(1, 1))                           # (1, 1) f32 bias
    return flat


def mlp_forward(x, params, *, tile_m=512, compute_dtype=jnp.float32):
    """x: (N, 1) float32.  params: PyTorch layout [(W (out, in), b (out,))] * 5."""
    n = x.shape[0]
    flat = _prepare_params(params, compute_dtype)

    # Batch in lanes: present x as a (1, N_pad) lane-major slab.
    tile = min(tile_m, ((n + 127) // 128) * 128)
    n_pad = pl.cdiv(n, tile) * tile
    xt = jnp.zeros((1, n_pad), jnp.float32).at[0, :n].set(x[:, 0])

    def resident(shape):
        return pl.BlockSpec(shape, lambda i: (0, 0))        # VMEM-resident across steps

    in_specs = [pl.BlockSpec((1, tile), lambda i: (0, i))]   # x: tiled over batch
    in_specs += [resident(a.shape) for a in flat]

    out = pl.pallas_call(
        _mlp_kernel,
        out_shape=jax.ShapeDtypeStruct((1, n_pad), jnp.float32),
        grid=(n_pad // tile,),
        in_specs=in_specs,
        out_specs=pl.BlockSpec((1, tile), lambda i: (0, i)),
        compiler_params=pltpu.CompilerParams(
            dimension_semantics=("parallel",)),
    )(xt, *flat)
    return out[0, :n].reshape(n, 1)


def init_params(key):
    """PyTorch nn.Linear layout and init: W (out, in), b (out,), U(-1/sqrt(fan_in), .)."""
    dims = [(HIDDEN, 1), (HIDDEN, HIDDEN), (HIDDEN, HIDDEN), (HIDDEN, HIDDEN), (1, HIDDEN)]
    params = []
    for (fan_out, fan_in) in dims:
        key, kw, kb = jax.random.split(key, 3)
        bound = 1.0 / (fan_in ** 0.5)
        w = jax.random.uniform(kw, (fan_out, fan_in), jnp.float32, -bound, bound)
        b = jax.random.uniform(kb, (fan_out,), jnp.float32, -bound, bound)
        params.append((w, b))
    return params


def reference_forward(x, params):
    h = x
    for i, (w, b) in enumerate(params):
        h = h @ w.T + b
        if i < len(params) - 1:
            h = jnp.maximum(h, 0.0)
    return h


if __name__ == "__main__":
    key = jax.random.PRNGKey(0)
    key, kx = jax.random.split(key)

    batch = 8
    x = jax.random.normal(kx, (batch, 1), jnp.float32)
    params = init_params(key)

    y_ref = reference_forward(x, params)

    # fp32 path — exact semantics of the PyTorch module.
    y = jax.block_until_ready(mlp_forward(x, params, compute_dtype=jnp.float32))
    assert y.shape == (batch, 1)
    assert jnp.allclose(y, y_ref, atol=1e-3, rtol=1e-3), "fp32 mismatch vs pure-JAX reference"

    # bf16 matmul-operand path (v6e/v7x fast MXU; fp32 accumulation + fp32 bias/ReLU).
    y_bf16 = jax.block_until_ready(mlp_forward(x, params, compute_dtype=jnp.bfloat16))
    assert jnp.allclose(y_bf16, y_ref, atol=1e-1, rtol=1e-1), "bf16 mismatch vs reference"

    print("KERNEL_OK")
</pallas_src>

<mosaic_0001>
module attributes {stable_mosaic.version = 11 : i64} {
  func.func @_mlp_kernel(%arg0: i32, %arg1: memref<1x128xf32, #tpu.memory_space<vmem>>, %arg2: memref<256x1xf32, #tpu.memory_space<vmem>>, %arg3: memref<256x1xf32, #tpu.memory_space<vmem>>, %arg4: memref<256x256xf32, #tpu.memory_space<vmem>>, %arg5: memref<256x1xf32, #tpu.memory_space<vmem>>, %arg6: memref<256x256xf32, #tpu.memory_space<vmem>>, %arg7: memref<256x1xf32, #tpu.memory_space<vmem>>, %arg8: memref<256x256xf32, #tpu.memory_space<vmem>>, %arg9: memref<256x1xf32, #tpu.memory_space<vmem>>, %arg10: memref<256x1xf32, #tpu.memory_space<vmem>>, %arg11: memref<1x1xf32, #tpu.memory_space<vmem>>, %arg12: memref<1x128xf32, #tpu.memory_space<vmem>>) attributes {dimension_semantics = [#tpu.dimension_semantics<parallel>], iteration_bounds = array<i64: 1>, scalar_prefetch = 0 : i64, scratch_operands = 0 : i64, tpu.core_type = #tpu.core_type<tc>, window_params = [{transform_indices = @transform_0, window_bounds = array<i64: 1, 128>}, {pipeline_mode = #tpu.pipeline_mode<synchronous>, transform_indices = @transform_1, window_bounds = array<i64: 256, 1>}, {pipeline_mode = #tpu.pipeline_mode<synchronous>, transform_indices = @transform_2, window_bounds = array<i64: 256, 1>}, {pipeline_mode = #tpu.pipeline_mode<synchronous>, transform_indices = @transform_3, window_bounds = array<i64: 256, 256>}, {pipeline_mode = #tpu.pipeline_mode<synchronous>, transform_indices = @transform_4, window_bounds = array<i64: 256, 1>}, {pipeline_mode = #tpu.pipeline_mode<synchronous>, transform_indices = @transform_5, window_bounds = array<i64: 256, 256>}, {pipeline_mode = #tpu.pipeline_mode<synchronous>, transform_indices = @transform_6, window_bounds = array<i64: 256, 1>}, {pipeline_mode = #tpu.pipeline_mode<synchronous>, transform_indices = @transform_7, window_bounds = array<i64: 256, 256>}, {pipeline_mode = #tpu.pipeline_mode<synchronous>, transform_indices = @transform_8, window_bounds = array<i64: 256, 1>}, {pipeline_mode = #tpu.pipeline_mode<synchronous>, transform_indices = @transform_9, window_bounds = array<i64: 256, 1>}, {pipeline_mode = #tpu.pipeline_mode<synchronous>, transform_indices = @transform_10, window_bounds = array<i64: 1, 1>}, {transform_indices = @transform_11, window_bounds = array<i64: 1, 128>}]} {
    %c0 = arith.constant 0 : index
    %c0_0 = arith.constant 0 : index
    %0 = vector.load %arg1[%c0, %c0_0] : memref<1x128xf32, #tpu.memory_space<vmem>>, vector<1x128xf32>
    %c0_1 = arith.constant 0 : index
    %c0_2 = arith.constant 0 : index
    %1 = vector.load %arg2[%c0_1, %c0_2] : memref<256x1xf32, #tpu.memory_space<vmem>>, vector<256x1xf32>
    %2 = vector.broadcast %1 : vector<256x1xf32> to vector<256x128xf32>
    %3 = vector.broadcast %0 : vector<1x128xf32> to vector<256x128xf32>
    %4 = arith.mulf %2, %3 : vector<256x128xf32>
    %c0_3 = arith.constant 0 : index
    %c0_4 = arith.constant 0 : index
    %5 = vector.load %arg3[%c0_3, %c0_4] : memref<256x1xf32, #tpu.memory_space<vmem>>, vector<256x1xf32>
    %6 = vector.broadcast %5 : vector<256x1xf32> to vector<256x128xf32>
    %7 = arith.addf %4, %6 : vector<256x128xf32>
    %cst = arith.constant 0.000000e+00 : f32
    %8 = vector.broadcast %cst : f32 to vector<256x128xf32>
    %9 = arith.maximumf %7, %8 : vector<256x128xf32>
    %c0_5 = arith.constant 0 : index
    %c0_6 = arith.constant 0 : index
    %10 = vector.load %arg4[%c0_5, %c0_6] : memref<256x256xf32, #tpu.memory_space<vmem>>, vector<256x256xf32>
    %cst_7 = arith.constant dense<0.000000e+00> : vector<256x128xf32>
    %11 = tpu.matmul %10, %9, %cst_7 {dimension_numbers = #tpu.dot_dimension_numbers<[1], [0], [0], [1], [0, 0, 1, 1], [], []>} : vector<256x256xf32>, vector<256x128xf32>, vector<256x128xf32> -> vector<256x128xf32>
    %c0_8 = arith.constant 0 : index
    %c0_9 = arith.constant 0 : index
    %12 = vector.load %arg5[%c0_8, %c0_9] : memref<256x1xf32, #tpu.memory_space<vmem>>, vector<256x1xf32>
    %13 = vector.broadcast %12 : vector<256x1xf32> to vector<256x128xf32>
    %14 = arith.addf %11, %13 : vector<256x128xf32>
    %cst_10 = arith.constant 0.000000e+00 : f32
    %15 = vector.broadcast %cst_10 : f32 to vector<256x128xf32>
    %16 = arith.maximumf %14, %15 : vector<256x128xf32>
    %c0_11 = arith.constant 0 : index
    %c0_12 = arith.constant 0 : index
    %17 = vector.load %arg6[%c0_11, %c0_12] : memref<256x256xf32, #tpu.memory_space<vmem>>, vector<256x256xf32>
    %cst_13 = arith.constant dense<0.000000e+00> : vector<256x128xf32>
    %18 = tpu.matmul %17, %16, %cst_13 {dimension_numbers = #tpu.dot_dimension_numbers<[1], [0], [0], [1], [0, 0, 1, 1], [], []>} : vector<256x256xf32>, vector<256x128xf32>, vector<256x128xf32> -> vector<256x128xf32>
    %c0_14 = arith.constant 0 : index
    %c0_15 = arith.constant 0 : index
    %19 = vector.load %arg7[%c0_14, %c0_15] : memref<256x1xf32, #tpu.memory_space<vmem>>, vector<256x1xf32>
    %20 = vector.broadcast %19 : vector<256x1xf32> to vector<256x128xf32>
    %21 = arith.addf %18, %20 : vector<256x128xf32>
    %cst_16 = arith.constant 0.000000e+00 : f32
    %22 = vector.broadcast %cst_16 : f32 to vector<256x128xf32>
    %23 = arith.maximumf %21, %22 : vector<256x128xf32>
    %c0_17 = arith.constant 0 : index
    %c0_18 = arith.constant 0 : index
    %24 = vector.load %arg8[%c0_17, %c0_18] : memref<256x256xf32, #tpu.memory_space<vmem>>, vector<256x256xf32>
    %cst_19 = arith.constant dense<0.000000e+00> : vector<256x128xf32>
    %25 = tpu.matmul %24, %23, %cst_19 {dimension_numbers = #tpu.dot_dimension_numbers<[1], [0], [0], [1], [0, 0, 1, 1], [], []>} : vector<256x256xf32>, vector<256x128xf32>, vector<256x128xf32> -> vector<256x128xf32>
    %c0_20 = arith.constant 0 : index
    %c0_21 = arith.constant 0 : index
    %26 = vector.load %arg9[%c0_20, %c0_21] : memref<256x1xf32, #tpu.memory_space<vmem>>, vector<256x1xf32>
    %27 = vector.broadcast %26 : vector<256x1xf32> to vector<256x128xf32>
    %28 = arith.addf %25, %27 : vector<256x128xf32>
    %cst_22 = arith.constant 0.000000e+00 : f32
    %29 = vector.broadcast %cst_22 : f32 to vector<256x128xf32>
    %30 = arith.maximumf %28, %29 : vector<256x128xf32>
    %c0_23 = arith.constant 0 : index
    %c0_24 = arith.constant 0 : index
    %31 = vector.load %arg10[%c0_23, %c0_24] : memref<256x1xf32, #tpu.memory_space<vmem>>, vector<256x1xf32>
    %32 = vector.broadcast %31 : vector<256x1xf32> to vector<256x128xf32>
    %33 = arith.mulf %30, %32 : vector<256x128xf32>
    %cst_25 = arith.constant dense<0.000000e+00> : vector<128xf32>
    %34 = vector.multi_reduction <add>, %33, %cst_25 [0] : vector<256x128xf32> to vector<128xf32>
    %35 = vector.shape_cast %34 : vector<128xf32> to vector<1x128xf32>
    %c0_26 = arith.constant 0 : index
    %c0_27 = arith.constant 0 : index
    %36 = vector.load %arg11[%c0_26, %c0_27] : memref<1x1xf32, #tpu.memory_space<vmem>>, vector<1x1xf32>
    %37 = vector.broadcast %36 : vector<1x1xf32> to vector<1x128xf32>
    %38 = arith.addf %35, %37 : vector<1x128xf32>
    %c0_28 = arith.constant 0 : index
    %c0_29 = arith.constant 0 : index
    %39 = vector.load %arg12[%c0_28, %c0_29] : memref<1x128xf32, #tpu.memory_space<vmem>>, vector<1x128xf32>
    tpu.vector_store %arg12[%c0_28, %c0_29], %38 {strides = array<i32>} : memref<1x128xf32, #tpu.memory_space<vmem>>, vector<1x128xf32>,
    return
  }
  func.func @transform_0(%arg0: i32) -> (i32, i32) {
    %c0_i32 = arith.constant 0 : i32
    %c0_i32_0 = arith.constant 0 : i32
    return %c0_i32, %arg0 : i32, i32
  }
  func.func @transform_1(%arg0: i32) -> (i32, i32) {
    %c0_i32 = arith.constant 0 : i32
    %c0_i32_0 = arith.constant 0 : i32
    %c0_i32_1 = arith.constant 0 : i32
    return %c0_i32, %c0_i32_0 : i32, i32
  }
  func.func @transform_2(%arg0: i32) -> (i32, i32) {
    %c0_i32 = arith.constant 0 : i32
    %c0_i32_0 = arith.constant 0 : i32
    %c0_i32_1 = arith.constant 0 : i32
    return %c0_i32, %c0_i32_0 : i32, i32
  }
  func.func @transform_3(%arg0: i32) -> (i32, i32) {
    %c0_i32 = arith.constant 0 : i32
    %c0_i32_0 = arith.constant 0 : i32
    %c0_i32_1 = arith.constant 0 : i32
    return %c0_i32, %c0_i32_0 : i32, i32
  }
  func.func @transform_4(%arg0: i32) -> (i32, i32) {
    %c0_i32 = arith.constant 0 : i32
    %c0_i32_0 = arith.constant 0 : i32
    %c0_i32_1 = arith.constant 0 : i32
    return %c0_i32, %c0_i32_0 : i32, i32
  }
  func.func @transform_5(%arg0: i32) -> (i32, i32) {
    %c0_i32 = arith.constant 0 : i32
    %c0_i32_0 = arith.constant 0 : i32
    %c0_i32_1 = arith.constant 0 : i32
    return %c0_i32, %c0_i32_0 : i32, i32
  }
  func.func @transform_6(%arg0: i32) -> (i32, i32) {
    %c0_i32 = arith.constant 0 : i32
    %c0_i32_0 = arith.constant 0 : i32
    %c0_i32_1 = arith.constant 0 : i32
    return %c0_i32, %c0_i32_0 : i32, i32
  }
  func.func @transform_7(%arg0: i32) -> (i32, i32) {
    %c0_i32 = arith.constant 0 : i32
    %c0_i32_0 = arith.constant 0 : i32
    %c0_i32_1 = arith.constant 0 : i32
    return %c0_i32, %c0_i32_0 : i32, i32
  }
  func.func @transform_8(%arg0: i32) -> (i32, i32) {
    %c0_i32 = arith.constant 0 : i32
    %c0_i32_0 = arith.constant 0 : i32
    %c0_i32_1 = arith.constant 0 : i32
    return %c0_i32, %c0_i32_0 : i32, i32
  }
  func.func @transform_9(%arg0: i32) -> (i32, i32) {
    %c0_i32 = arith.constant 0 : i32
    %c0_i32_0 = arith.constant 0 : i32
    %c0_i32_1 = arith.constant 0 : i32
    return %c0_i32, %c0_i32_0 : i32, i32
  }
  func.func @transform_10(%arg0: i32) -> (i32, i32) {
    %c0_i32 = arith.constant 0 : i32
    %c0_i32_0 = arith.constant 0 : i32
    %c0_i32_1 = arith.constant 0 : i32
    return %c0_i32, %c0_i32_0 : i32, i32
  }
  func.func @transform_11(%arg0: i32) -> (i32, i32) {
    %c0_i32 = arith.constant 0 : i32
    %c0_i32_0 = arith.constant 0 : i32
    return %c0_i32, %arg0 : i32, i32
  }
}

</mosaic_0001>

<bundles_post_ra>
// kernel: tpu_custom_call.1
= control target key start
LH: loop header
LB: loop body
LE: loop exit
PB: predicated region body
PF: predicated region fallthrough
CT: control target
= control target key end

     0   :  { %s4065_s0 = inlined_call_operand.vmem [shape: f32[1,128], index: 0, kind: input, shape index: {}]   ;;  %s4066_s1 = inlined_call_operand.vmem [shape: f32[256,1], index: 1, kind: input, shape index: {}]   ;;  %s4067_s2 = inlined_call_operand.vmem [shape: f32[256,1], index: 2, kind: input, shape index: {}]   ;;  %s4068_s3 = inlined_call_operand.vmem [shape: f32[256,256], index: 3, kind: input, shape index: {}]   ;;  %s4069_s4 = inlined_call_operand.vmem [shape: f32[256,1], index: 4, kind: input, shape index: {}]   ;;  %s4070_s5 = inlined_call_operand.vmem [shape: f32[256,256], index: 5, kind: input, shape index: {}]   ;;  %s4071_s6 = inlined_call_operand.vmem [shape: f32[256,1], index: 6, kind: input, shape index: {}]   ;;  %s4072_s7 = inlined_call_operand.vmem [shape: f32[256,256], index: 7, kind: input, shape index: {}]   ;;  %s4073_s8 = inlined_call_operand.vmem [shape: f32[256,1], index: 8, kind: input, shape index: {}]   ;;  %s4074_s9 = inlined_call_operand.vmem [shape: f32[256,1], index: 9, kind: input, shape index: {}]   ;;  %s4075_s10 = inlined_call_operand.<no memory space> [shape: f32[1,1], index: 10, kind: input, shape index: {}]   ;;  %s4076_s11 = inlined_call_operand.hbm [shape: f32[1,128], index: 11, kind: output, shape index: {}]  }
   0x1   :  { %v16_v0 = vstv %s4075_s10 }
   0x2   :  { %17 = vst [vmem:[#allocation2] sm:$0x1] %v16_v0 }
   0x3   :  { %v272_v1 = vld [vmem:[%s4067_s2] sm:$0xff]  ;;  %v2560_v3 = vmov 0   ;;  %v273_v4 = vld [vmem:[%s4067_s2 + $0x8] sm:$0xff]  ;;  %v45_v6 = vld [vmem:[%s4066_s1 + $0x18] sm:$0xff]  ;;  %v2561_v10 = vmov 0.0|0.0  }
   0x4   :  { %v42_v2 = vld [vmem:[%s4066_s1] sm:$0xff]  ;;  %2535 = vset.pattern.permute.xlu1 %v2560_v3  ;;  %2534 = vset.pattern.permute.xlu0 %v2560_v3  ;;  %v43_v5 = vld [vmem:[%s4066_s1 + $0x8] sm:$0xff]  ;;  %v44_v7 = vld [vmem:[%s4066_s1 + $0x10] sm:$0xff] }
   0x5   :  { %306 = vperm.xlu1 %2535, %v272_v1   ;;  %76 = vperm.xlu0 %2534, %v42_v2   ;;  %v275_v8 = vld [vmem:[%s4067_s2 + $0x18] sm:$0xff]  ;;  %v274_v9 = vld [vmem:[%s4067_s2 + $0x10] sm:$0xff]  ;;  %v47_v11 = vld [vmem:[%s4066_s1 + $0x28] sm:$0xff] }
   0x6   :  { %2355 = vmatprep.subr.bf16.mxu0 %v2561_v10  ;;  %2499 = vmatprep.subr.bf16.mxu1 %v2561_v10  ;;  %v46_v12 = vld [vmem:[%s4066_s1 + $0x20] sm:$0xff]  ;;  %v277_v13 = vld [vmem:[%s4067_s2 + $0x28] sm:$0xff]  ;;  %v49_v15 = vld [vmem:[%s4066_s1 + $0x38] sm:$0xff] }
   0x7   :  { %v276_v14 = vld [vmem:[%s4067_s2 + $0x20] sm:$0xff]  ;;  %v48_v16 = vld [vmem:[%s4066_s1 + $0x30] sm:$0xff] }
   0x9   :  { %311 = vperm.xlu1 %2535, %v273_v4   ;;  %81 = vperm.xlu0 %2534, %v43_v5  }
   0xd   :  { %91 = vperm.xlu1 %2535, %v45_v6   ;;  %86 = vperm.xlu0 %2534, %v44_v7  }
  0x11   :  { %321 = vperm.xlu1 %2535, %v275_v8   ;;  %316 = vperm.xlu0 %2534, %v274_v9  }
  0x15   :  { %101 = vperm.xlu1 %2535, %v47_v11   ;;  %96 = vperm.xlu0 %2534, %v46_v12  }
  0x19   :  { %331 = vperm.xlu1 %2535, %v277_v13   ;;  %326 = vperm.xlu0 %2534, %v276_v14  }
  0x1a   :  { %18 = vsyncpa [#allocation4], 0  ;;  %v279_v17 = vld [vmem:[%s4067_s2 + $0x38] sm:$0xff]  ;;  %v278_v18 = vld [vmem:[%s4067_s2 + $0x30] sm:$0xff] }
  0x1b   :  { %v51_v19 = vld [vmem:[%s4066_s1 + $0x48] sm:$0xff]  ;;  %v50_v20 = vld [vmem:[%s4066_s1 + $0x40] sm:$0xff]  ;;  %v53_v23 = vld [vmem:[%s4066_s1 + $0x58] sm:$0xff] }
  0x1c   :  { %v281_v21 = vld [vmem:[%s4067_s2 + $0x48] sm:$0xff]  ;;  %v280_v22 = vld [vmem:[%s4067_s2 + $0x40] sm:$0xff]  ;;  %v52_v24 = vld [vmem:[%s4066_s1 + $0x50] sm:$0xff] }
  0x1d   :  { %111 = vperm.xlu1 %2535, %v49_v15   ;;  %106 = vperm.xlu0 %2534, %v48_v16   ;;  %v283_v25 = vld [vmem:[%s4067_s2 + $0x58] sm:$0xff]  ;;  %v282_v26 = vld [vmem:[%s4067_s2 + $0x50] sm:$0xff]  ;;  %v55_v27 = vld [vmem:[%s4066_s1 + $0x68] sm:$0xff] }
  0x1e   :  { %v54_v28 = vld [vmem:[%s4066_s1 + $0x60] sm:$0xff]  ;;  %v285_v29 = vld [vmem:[%s4067_s2 + $0x68] sm:$0xff]  ;;  %v57_v31 = vld [vmem:[%s4066_s1 + $0x78] sm:$0xff] }
  0x1f   :  { %v284_v30 = vld [vmem:[%s4067_s2 + $0x60] sm:$0xff]  ;;  %v56_v32 = vld [vmem:[%s4066_s1 + $0x70] sm:$0xff]  ;;  %v287_v33 = vld [vmem:[%s4067_s2 + $0x78] sm:$0xff] }
  0x20   :  { %v286_v34 = vld [vmem:[%s4067_s2 + $0x70] sm:$0xff]  ;;  %v59_v35 = vld [vmem:[%s4066_s1 + $0x88] sm:$0xff]  ;;  %v58_v36 = vld [vmem:[%s4066_s1 + $0x80] sm:$0xff] }
  0x21   :  { %341 = vperm.xlu1 %2535, %v279_v17   ;;  %336 = vperm.xlu0 %2534, %v278_v18   ;;  %v289_v37 = vld [vmem:[%s4067_s2 + $0x88] sm:$0xff]  ;;  %v288_v38 = vld [vmem:[%s4067_s2 + $0x80] sm:$0xff]  ;;  %v61_v39 = vld [vmem:[%s4066_s1 + $0x98] sm:$0xff] }
  0x22   :  { %v60_v40 = vld [vmem:[%s4066_s1 + $0x90] sm:$0xff]  ;;  %v291_v41 = vld [vmem:[%s4067_s2 + $0x98] sm:$0xff]  ;;  %v63_v43 = vld [vmem:[%s4066_s1 + $0xa8] sm:$0xff] }
  0x23   :  { %v290_v42 = vld [vmem:[%s4067_s2 + $0x90] sm:$0xff]  ;;  %v62_v44 = vld [vmem:[%s4066_s1 + $0xa0] sm:$0xff]  ;;  %v293_v45 = vld [vmem:[%s4067_s2 + $0xa8] sm:$0xff] }
  0x24   :  { %v292_v46 = vld [vmem:[%s4067_s2 + $0xa0] sm:$0xff]  ;;  %v65_v47 = vld [vmem:[%s4066_s1 + $0xb8] sm:$0xff]  ;;  %v64_v48 = vld [vmem:[%s4066_s1 + $0xb0] sm:$0xff] }
  0x25   :  { %121 = vperm.xlu1 %2535, %v51_v19   ;;  %116 = vperm.xlu0 %2534, %v50_v20   ;;  %v295_v49 = vld [vmem:[%s4067_s2 + $0xb8] sm:$0xff]  ;;  %v294_v50 = vld [vmem:[%s4067_s2 + $0xb0] sm:$0xff]  ;;  %v67_v51 = vld [vmem:[%s4066_s1 + $0xc8] sm:$0xff] }
  0x26   :  { %v66_v52 = vld [vmem:[%s4066_s1 + $0xc0] sm:$0xff]  ;;  %v297_v53 = vld [vmem:[%s4067_s2 + $0xc8] sm:$0xff]  ;;  %v69_v55 = vld [vmem:[%s4066_s1 + $0xd8] sm:$0xff] }
  0x27   :  { %v296_v54 = vld [vmem:[%s4067_s2 + $0xc0] sm:$0xff]  ;;  %v68_v56 = vld [vmem:[%s4066_s1 + $0xd0] sm:$0xff]  ;;  %v299_v57 = vld [vmem:[%s4067_s2 + $0xd8] sm:$0xff] }
  0x28   :  { %v298_v58 = vld [vmem:[%s4067_s2 + $0xd0] sm:$0xff]  ;;  %v71_v59 = vld [vmem:[%s4066_s1 + $0xe8] sm:$0xff]  ;;  %v70_v60 = vld [vmem:[%s4066_s1 + $0xe0] sm:$0xff] }
  0x29   :  { %351 = vperm.xlu1 %2535, %v281_v21   ;;  %346 = vperm.xlu0 %2534, %v280_v22   ;;  %v301_v61 = vld [vmem:[%s4067_s2 + $0xe8] sm:$0xff]  ;;  %v300_v62 = vld [vmem:[%s4067_s2 + $0xe0] sm:$0xff]  ;;  %v73_v63 = vld [vmem:[%s4066_s1 + $0xf8] sm:$0xff] }
  0x2a   :  { %v72_v0 = vld [vmem:[%s4066_s1 + $0xf0] sm:$0xff]  ;;  %v303_v1 = vld [vmem:[%s4067_s2 + $0xf8] sm:$0xff]  ;;  %v2823_v3 = vld [vmem:[%s4065_s0] ss:$0 sm:$0xff] }
  0x2b   :  { %v302_v2 = vld [vmem:[%s4067_s2 + $0xf0] sm:$0xff]  ;;  %v593_v4 = vld [vmem:[%s4069_s4 + $0x8] sm:$0xff]  ;;  %v592_v5 = vld [vmem:[%s4069_s4] sm:$0xff] }
  0x2c   :  { %v595_v9 = vld [vmem:[%s4069_s4 + $0x18] sm:$0xff]  ;;  %v594_v11 = vld [vmem:[%s4069_s4 + $0x10] sm:$0xff]  ;;  %v529_v14 = vld [vmem:[%s4068_s3 + $0x8] sm:$0xff] }
  0x2d   :  { %131 = vperm.xlu1 %2535, %v53_v23   ;;  %126 = vperm.xlu0 %2534, %v52_v24   ;;  %v561_v15 = vld [vmem:[%s4068_s3 + $0x108] sm:$0xff]  ;;  %v596_v19 = vld [vmem:[%s4069_s4 + $0x20] sm:$0xff] }
  0x2e   :  { %v597_v18 = vld [vmem:[%s4069_s4 + $0x28] sm:$0xff]  ;;  %848 = vmatprep.mubr.f32.mxu0 %v529_v14  ;;  %928 = vmatprep.mubr.f32.mxu1 %v561_v15 }
  0x31   :  { %361 = vperm.xlu1 %2535, %v283_v25   ;;  %356 = vperm.xlu0 %2534, %v282_v26   ;;  %v599_v25 = vld [vmem:[%s4069_s4 + $0x38] sm:$0xff]  ;;  %v598_v26 = vld [vmem:[%s4069_s4 + $0x30] sm:$0xff] }
  0x35   :  { %141 = vperm.xlu1 %2535, %v55_v27   ;;  %136 = vperm.xlu0 %2534, %v54_v28  }
  0x39   :  { %371 = vperm.xlu1 %2535, %v285_v29   ;;  %366 = vperm.xlu0 %2534, %v284_v30  }
  0x3d   :  { %151 = vperm.xlu1 %2535, %v57_v31   ;;  %146 = vperm.xlu0 %2534, %v56_v32  }
  0x41   :  { %381 = vperm.xlu1 %2535, %v287_v33   ;;  %376 = vperm.xlu0 %2534, %v286_v34   ;;  %v601_v34 = vld [vmem:[%s4069_s4 + $0x48] sm:$0xff] }
  0x45   :  { %161 = vperm.xlu1 %2535, %v59_v35   ;;  %156 = vperm.xlu0 %2534, %v58_v36   ;;  %v600_v35 = vld [vmem:[%s4069_s4 + $0x40] sm:$0xff] }
  0x49   :  { %391 = vperm.xlu1 %2535, %v289_v37   ;;  %386 = vperm.xlu0 %2534, %v288_v38  }
  0x4d   :  { %171 = vperm.xlu1 %2535, %v61_v39   ;;  %166 = vperm.xlu0 %2534, %v60_v40  }
  0x51   :  { %401 = vperm.xlu1 %2535, %v291_v41   ;;  %396 = vperm.xlu0 %2534, %v290_v42   ;;  %v603_v41 = vld [vmem:[%s4069_s4 + $0x58] sm:$0xff]  ;;  %v602_v42 = vld [vmem:[%s4069_s4 + $0x50] sm:$0xff] }
  0x55   :  { %181 = vperm.xlu1 %2535, %v63_v43   ;;  %176 = vperm.xlu0 %2534, %v62_v44  }
  0x59   :  { %411 = vperm.xlu1 %2535, %v293_v45   ;;  %406 = vperm.xlu0 %2534, %v292_v46  }
  0x5d   :  { %191 = vperm.xlu1 %2535, %v65_v47   ;;  %186 = vperm.xlu0 %2534, %v64_v48  }
  0x61   :  { %421 = vperm.xlu1 %2535, %v295_v49   ;;  %416 = vperm.xlu0 %2534, %v294_v50   ;;  %v605_v49 = vld [vmem:[%s4069_s4 + $0x68] sm:$0xff]  ;;  %v604_v50 = vld [vmem:[%s4069_s4 + $0x60] sm:$0xff] }
  0x65   :  { %201 = vperm.xlu1 %2535, %v67_v51   ;;  %196 = vperm.xlu0 %2534, %v66_v52  }
  0x69   :  { %431 = vperm.xlu1 %2535, %v297_v53   ;;  %426 = vperm.xlu0 %2534, %v296_v54  }
  0x6d   :  { %211 = vperm.xlu1 %2535, %v69_v55   ;;  %206 = vperm.xlu0 %2534, %v68_v56   ;;  %v607_v56 = vld [vmem:[%s4069_s4 + $0x78] sm:$0xff] }
  0x71   :  { %441 = vperm.xlu1 %2535, %v299_v57   ;;  %436 = vperm.xlu0 %2534, %v298_v58   ;;  %v606_v57 = vld [vmem:[%s4069_s4 + $0x70] sm:$0xff] }
  0x75   :  { %221 = vperm.xlu1 %2535, %v71_v59   ;;  %216 = vperm.xlu0 %2534, %v70_v60  }
  0x79   :  { %451 = vperm.xlu1 %2535, %v301_v61   ;;  %446 = vperm.xlu0 %2534, %v300_v62  }
  0x7d   :  { %231 = vperm.xlu1 %2535, %v73_v63   ;;  %226 = vperm.xlu0 %2534, %v72_v0   ;;  %v609_v0 = vld [vmem:[%s4069_s4 + $0x88] sm:$0xff] }
  0x81   :  { %461 = vperm.xlu1 %2535, %v303_v1   ;;  %456 = vperm.xlu0 %2534, %v302_v2   ;;  %v608_v1 = vld [vmem:[%s4069_s4 + $0x80] sm:$0xff] }
  0x84   :  { %v307_v6 = vpop.permute.xlu1 %306  ;;  %v77_v7 = vpop.permute.xlu0 %76 }
  0x85   :  { %v240_v8 = vmul.f32 %v2823_v3, %v77_v7  ;;  %631 = vperm.xlu1 %2535, %v593_v4   ;;  %626 = vperm.xlu0 %2534, %v592_v5  }
  0x87   :  { %v464_v16 = vadd.f32 %v307_v6, %v240_v8  ;;  %v611_v8 = vld [vmem:[%s4069_s4 + $0x98] sm:$0xff] }
  0x88   :  { %v312_v12 = vpop.permute.xlu1 %311  ;;  %v82_v13 = vpop.permute.xlu0 %81 }
  0x89   :  { %v241_v17 = vmul.f32 %v2823_v3, %v82_v13  ;;  %641 = vperm.xlu1 %2535, %v595_v9   ;;  %636 = vperm.xlu0 %2534, %v594_v11   ;;  %v496_v23 = vmax.f32 %v464_v16, 0.0  ;;  %v610_v9 = vld [vmem:[%s4069_s4 + $0x90] sm:$0xff] }
  0x8b   :  { %v465_v20 = vadd.f32 %v312_v12, %v241_v17  ;;  %v613_v17 = vld [vmem:[%s4069_s4 + $0xa8] sm:$0xff] }
  0x8c   :  { %v92_v21 = vpop.permute.xlu1 %91  ;;  %v87_v22 = vpop.permute.xlu0 %86 }
  0x8d   :  { %651 = vperm.xlu1 %2535, %v597_v18   ;;  %646 = vperm.xlu0 %2534, %v596_v19   ;;  %v497_v24 = vmax.f32 %v465_v20, 0.0  ;;  %v243_v27 = vmul.f32 %v2823_v3, %v92_v21  ;;  %v242_v28 = vmul.f32 %v2823_v3, %v87_v22  ;;  %v612_v18 = vld [vmem:[%s4069_s4 + $0xa0] sm:$0xff] }
  0x8f   :  { %v2356_v29 = vpack.c.bf16 %v497_v24, %v496_v23  ;;  %v615_v24 = vld [vmem:[%s4069_s4 + $0xb8] sm:$0xff] }
  0x90   :  { %v322_v30 = vpop.permute.xlu1 %321  ;;  %v317_v31 = vpop.permute.xlu0 %316 }
  0x91   :  { %v467_v32 = vadd.f32 %v322_v30, %v243_v27  ;;  %v466_v33 = vadd.f32 %v317_v31, %v242_v28  ;;  %661 = vperm.xlu1 %2535, %v599_v25   ;;  %656 = vperm.xlu0 %2534, %v598_v26   ;;  %v614_v25 = vld [vmem:[%s4069_s4 + $0xb0] sm:$0xff] }
  0x92   :  { %2357 = vmatpush1.bf16.msra.mxu0 %v2356_v29  ;;  %2515 = vmatpush1.bf16.msra.mxu1 %v2356_v29 }
  0x93   :  { %v499_v36 = vmax.f32 %v467_v32, 0.0  ;;  %v498_v37 = vmax.f32 %v466_v33, 0.0  ;;  %2358 = vmatprep.subr.bf16.mxu0 %v2561_v10  ;;  %2500 = vmatprep.subr.bf16.mxu1 %v2561_v10  ;;  %v617_v32 = vld [vmem:[%s4069_s4 + $0xc8] sm:$0xff]  ;;  %v616_v33 = vld [vmem:[%s4069_s4 + $0xc0] sm:$0xff] }
  0x94   :  { %v102_v38 = vpop.permute.xlu1 %101  ;;  %v97_v39 = vpop.permute.xlu0 %96 }
  0x95   :  { %671 = vperm.xlu1 %2535, %v601_v34   ;;  %666 = vperm.xlu0 %2534, %v600_v35   ;;  %v2359_v40 = vpack.c.bf16 %v499_v36, %v498_v37  ;;  %v245_v43 = vmul.f32 %v2823_v3, %v102_v38  ;;  %v244_v44 = vmul.f32 %v2823_v3, %v97_v39  ;;  %v619_v39 = vld [vmem:[%s4069_s4 + $0xd8] sm:$0xff] }
  0x97   :  { %2360 = vmatpush1.bf16.msra.mxu0 %v2359_v40  ;;  %2516 = vmatpush1.bf16.msra.mxu1 %v2359_v40  ;;  %v618_v40 = vld [vmem:[%s4069_s4 + $0xd0] sm:$0xff] }
  0x98   :  { %v332_v45 = vpop.permute.xlu1 %331  ;;  %v327_v46 = vpop.permute.xlu0 %326  ;;  %2361 = vmatprep.subr.bf16.mxu0 %v2561_v10  ;;  %2501 = vmatprep.subr.bf16.mxu1 %v2561_v10 }
  0x99   :  { %v469_v47 = vadd.f32 %v332_v45, %v245_v43  ;;  %v468_v48 = vadd.f32 %v327_v46, %v244_v44  ;;  %681 = vperm.xlu1 %2535, %v603_v41   ;;  %676 = vperm.xlu0 %2534, %v602_v42  }
  0x9b   :  { %v501_v51 = vmax.f32 %v469_v47, 0.0  ;;  %v500_v52 = vmax.f32 %v468_v48, 0.0  ;;  %v621_v47 = vld [vmem:[%s4069_s4 + $0xe8] sm:$0xff]  ;;  %v620_v48 = vld [vmem:[%s4069_s4 + $0xe0] sm:$0xff] }
  0x9c   :  { %v112_v53 = vpop.permute.xlu1 %111  ;;  %v107_v54 = vpop.permute.xlu0 %106 }
  0x9d   :  { %691 = vperm.xlu1 %2535, %v605_v49   ;;  %686 = vperm.xlu0 %2534, %v604_v50   ;;  %v2362_v55 = vpack.c.bf16 %v501_v51, %v500_v52  ;;  %v247_v58 = vmul.f32 %v2823_v3, %v112_v53  ;;  %v246_v59 = vmul.f32 %v2823_v3, %v107_v54  ;;  %v623_v54 = vld [vmem:[%s4069_s4 + $0xf8] sm:$0xff] }
  0x9f   :  { %2363 = vmatpush1.bf16.msra.mxu0 %v2362_v55  ;;  %2517 = vmatpush1.bf16.msra.mxu1 %v2362_v55  ;;  %v622_v55 = vld [vmem:[%s4069_s4 + $0xf0] sm:$0xff] }
  0xa0   :  { %v342_v60 = vpop.permute.xlu1 %341  ;;  %v337_v61 = vpop.permute.xlu0 %336  ;;  %2364 = vmatprep.subr.bf16.mxu0 %v2561_v10  ;;  %2502 = vmatprep.subr.bf16.mxu1 %v2561_v10 }
  0xa1   :  { %v471_v62 = vadd.f32 %v342_v60, %v247_v58  ;;  %v470_v63 = vadd.f32 %v337_v61, %v246_v59  ;;  %701 = vperm.xlu1 %2535, %v607_v56   ;;  %696 = vperm.xlu0 %2534, %v606_v57  }
  0xa3   :  { %v503_v2 = vmax.f32 %v471_v62, 0.0  ;;  %v502_v4 = vmax.f32 %v470_v63, 0.0  ;;  %v1106_v62 = vld [vmem:[%s4071_s6 + $0x8] sm:$0xff]  ;;  %v1105_v63 = vld [vmem:[%s4071_s6] sm:$0xff] }
  0xa4   :  { %v122_v5 = vpop.permute.xlu1 %121  ;;  %v117_v6 = vpop.permute.xlu0 %116 }
  0xa5   :  { %711 = vperm.xlu1 %2535, %v609_v0   ;;  %706 = vperm.xlu0 %2534, %v608_v1   ;;  %v2365_v7 = vpack.c.bf16 %v503_v2, %v502_v4  ;;  %v249_v11 = vmul.f32 %v2823_v3, %v122_v5  ;;  %v248_v12 = vmul.f32 %v2823_v3, %v117_v6  ;;  %v1108_v6 = vld [vmem:[%s4071_s6 + $0x18] sm:$0xff] }
  0xa7   :  { %2366 = vmatpush1.bf16.msra.mxu0 %v2365_v7  ;;  %2518 = vmatpush1.bf16.msra.mxu1 %v2365_v7  ;;  %v1107_v7 = vld [vmem:[%s4071_s6 + $0x10] sm:$0xff] }
  0xa8   :  { %v352_v13 = vpop.permute.xlu1 %351  ;;  %v347_v14 = vpop.permute.xlu0 %346  ;;  %2367 = vmatprep.subr.bf16.mxu0 %v2561_v10  ;;  %2503 = vmatprep.subr.bf16.mxu1 %v2561_v10 }
  0xa9   :  { %v473_v15 = vadd.f32 %v352_v13, %v249_v11  ;;  %v472_v16 = vadd.f32 %v347_v14, %v248_v12  ;;  %721 = vperm.xlu1 %2535, %v611_v8   ;;  %716 = vperm.xlu0 %2534, %v610_v9  }
  0xab   :  { %v505_v19 = vmax.f32 %v473_v15, 0.0  ;;  %v504_v20 = vmax.f32 %v472_v16, 0.0  ;;  %v1110_v15 = vld [vmem:[%s4071_s6 + $0x28] sm:$0xff]  ;;  %v1109_v16 = vld [vmem:[%s4071_s6 + $0x20] sm:$0xff] }
  0xac   :  { %v132_v21 = vpop.permute.xlu1 %131  ;;  %v127_v22 = vpop.permute.xlu0 %126 }
  0xad   :  { %731 = vperm.xlu1 %2535, %v613_v17   ;;  %726 = vperm.xlu0 %2534, %v612_v18   ;;  %v2368_v23 = vpack.c.bf16 %v505_v19, %v504_v20  ;;  %v251_v26 = vmul.f32 %v2823_v3, %v132_v21  ;;  %v250_v27 = vmul.f32 %v2823_v3, %v127_v22  ;;  %v1112_v22 = vld [vmem:[%s4071_s6 + $0x38] sm:$0xff] }
  0xaf   :  { %2369 = vmatpush1.bf16.msra.mxu0 %v2368_v23  ;;  %2519 = vmatpush1.bf16.msra.mxu1 %v2368_v23  ;;  %v1111_v23 = vld [vmem:[%s4071_s6 + $0x30] sm:$0xff] }
  0xb0   :  { %v362_v28 = vpop.permute.xlu1 %361  ;;  %v357_v29 = vpop.permute.xlu0 %356  ;;  %2370 = vmatprep.subr.bf16.mxu0 %v2561_v10  ;;  %2504 = vmatprep.subr.bf16.mxu1 %v2561_v10 }
  0xb1   :  { %v475_v30 = vadd.f32 %v362_v28, %v251_v26  ;;  %v474_v31 = vadd.f32 %v357_v29, %v250_v27  ;;  %741 = vperm.xlu1 %2535, %v615_v24   ;;  %736 = vperm.xlu0 %2534, %v614_v25  }
  0xb3   :  { %v507_v34 = vmax.f32 %v475_v30, 0.0  ;;  %v506_v35 = vmax.f32 %v474_v31, 0.0  ;;  %v1114_v30 = vld [vmem:[%s4071_s6 + $0x48] sm:$0xff]  ;;  %v1113_v31 = vld [vmem:[%s4071_s6 + $0x40] sm:$0xff] }
  0xb4   :  { %v142_v36 = vpop.permute.xlu1 %141  ;;  %v137_v37 = vpop.permute.xlu0 %136 }
  0xb5   :  { %751 = vperm.xlu1 %2535, %v617_v32   ;;  %746 = vperm.xlu0 %2534, %v616_v33   ;;  %v2371_v38 = vpack.c.bf16 %v507_v34, %v506_v35  ;;  %v253_v41 = vmul.f32 %v2823_v3, %v142_v36  ;;  %v252_v42 = vmul.f32 %v2823_v3, %v137_v37  ;;  %v1116_v37 = vld [vmem:[%s4071_s6 + $0x58] sm:$0xff] }
  0xb7   :  { %2372 = vmatpush1.bf16.msra.mxu0 %v2371_v38  ;;  %2520 = vmatpush1.bf16.msra.mxu1 %v2371_v38  ;;  %v1115_v38 = vld [vmem:[%s4071_s6 + $0x50] sm:$0xff] }
  0xb8   :  { %v372_v43 = vpop.permute.xlu1 %371  ;;  %v367_v44 = vpop.permute.xlu0 %366  ;;  %2373 = vmatprep.subr.bf16.mxu0 %v2561_v10  ;;  %2505 = vmatprep.subr.bf16.mxu1 %v2561_v10 }
  0xb9   :  { %v477_v45 = vadd.f32 %v372_v43, %v253_v41  ;;  %v476_v46 = vadd.f32 %v367_v44, %v252_v42  ;;  %761 = vperm.xlu1 %2535, %v619_v39   ;;  %756 = vperm.xlu0 %2534, %v618_v40  }
  0xbb   :  { %v509_v49 = vmax.f32 %v477_v45, 0.0  ;;  %v508_v50 = vmax.f32 %v476_v46, 0.0  ;;  %v1118_v45 = vld [vmem:[%s4071_s6 + $0x68] sm:$0xff]  ;;  %v1117_v46 = vld [vmem:[%s4071_s6 + $0x60] sm:$0xff] }
  0xbc   :  { %v152_v51 = vpop.permute.xlu1 %151  ;;  %v147_v52 = vpop.permute.xlu0 %146 }
  0xbd   :  { %771 = vperm.xlu1 %2535, %v621_v47   ;;  %766 = vperm.xlu0 %2534, %v620_v48   ;;  %v2374_v53 = vpack.c.bf16 %v509_v49, %v508_v50  ;;  %v255_v56 = vmul.f32 %v2823_v3, %v152_v51  ;;  %v254_v57 = vmul.f32 %v2823_v3, %v147_v52  ;;  %v1120_v52 = vld [vmem:[%s4071_s6 + $0x78] sm:$0xff] }
  0xbf   :  { %2375 = vmatpush1.bf16.msra.mxu0 %v2374_v53  ;;  %2521 = vmatpush1.bf16.msra.mxu1 %v2374_v53  ;;  %v1119_v53 = vld [vmem:[%s4071_s6 + $0x70] sm:$0xff] }
  0xc0   :  { %v382_v58 = vpop.permute.xlu1 %381  ;;  %v377_v59 = vpop.permute.xlu0 %376  ;;  %2376 = vmatprep.subr.bf16.mxu0 %v2561_v10  ;;  %2506 = vmatprep.subr.bf16.mxu1 %v2561_v10 }
  0xc1   :  { %v479_v60 = vadd.f32 %v382_v58, %v255_v56  ;;  %v478_v61 = vadd.f32 %v377_v59, %v254_v57  ;;  %781 = vperm.xlu1 %2535, %v623_v54   ;;  %776 = vperm.xlu0 %2534, %v622_v55  }
  0xc3   :  { %v511_v0 = vmax.f32 %v479_v60, 0.0  ;;  %v510_v1 = vmax.f32 %v478_v61, 0.0  ;;  %v1122_v60 = vld [vmem:[%s4071_s6 + $0x88] sm:$0xff]  ;;  %v1121_v61 = vld [vmem:[%s4071_s6 + $0x80] sm:$0xff] }
  0xc4   :  { %v162_v2 = vpop.permute.xlu1 %161  ;;  %v157_v4 = vpop.permute.xlu0 %156 }
  0xc5   :  { %1144 = vperm.xlu1 %2535, %v1106_v62   ;;  %1139 = vperm.xlu0 %2534, %v1105_v63   ;;  %v2377_v5 = vpack.c.bf16 %v511_v0, %v510_v1  ;;  %v257_v8 = vmul.f32 %v2823_v3, %v162_v2  ;;  %v256_v9 = vmul.f32 %v2823_v3, %v157_v4  ;;  %v1124_v4 = vld [vmem:[%s4071_s6 + $0x98] sm:$0xff] }
  0xc7   :  { %2378 = vmatpush1.bf16.msra.mxu0 %v2377_v5  ;;  %2522 = vmatpush1.bf16.msra.mxu1 %v2377_v5  ;;  %v1123_v5 = vld [vmem:[%s4071_s6 + $0x90] sm:$0xff] }
  0xc8   :  { %v392_v11 = vpop.permute.xlu1 %391  ;;  %v387_v12 = vpop.permute.xlu0 %386  ;;  %2379 = vmatprep.subr.bf16.mxu0 %v2561_v10  ;;  %2507 = vmatprep.subr.bf16.mxu1 %v2561_v10 }
  0xc9   :  { %v481_v13 = vadd.f32 %v392_v11, %v257_v8  ;;  %v480_v14 = vadd.f32 %v387_v12, %v256_v9  ;;  %1154 = vperm.xlu1 %2535, %v1108_v6   ;;  %1149 = vperm.xlu0 %2534, %v1107_v7  }
  0xcb   :  { %v513_v17 = vmax.f32 %v481_v13, 0.0  ;;  %v512_v18 = vmax.f32 %v480_v14, 0.0  ;;  %v1126_v13 = vld [vmem:[%s4071_s6 + $0xa8] sm:$0xff]  ;;  %v1125_v14 = vld [vmem:[%s4071_s6 + $0xa0] sm:$0xff] }
  0xcc   :  { %v172_v19 = vpop.permute.xlu1 %171  ;;  %v167_v20 = vpop.permute.xlu0 %166 }
  0xcd   :  { %1164 = vperm.xlu1 %2535, %v1110_v15   ;;  %1159 = vperm.xlu0 %2534, %v1109_v16   ;;  %v2380_v21 = vpack.c.bf16 %v513_v17, %v512_v18  ;;  %v259_v24 = vmul.f32 %v2823_v3, %v172_v19  ;;  %v258_v25 = vmul.f32 %v2823_v3, %v167_v20  ;;  %v1128_v20 = vld [vmem:[%s4071_s6 + $0xb8] sm:$0xff] }
  0xcf   :  { %2381 = vmatpush1.bf16.msra.mxu0 %v2380_v21  ;;  %2523 = vmatpush1.bf16.msra.mxu1 %v2380_v21  ;;  %v1127_v21 = vld [vmem:[%s4071_s6 + $0xb0] sm:$0xff] }
  0xd0   :  { %v402_v26 = vpop.permute.xlu1 %401  ;;  %v397_v27 = vpop.permute.xlu0 %396  ;;  %2382 = vmatprep.subr.bf16.mxu0 %v2561_v10  ;;  %2508 = vmatprep.subr.bf16.mxu1 %v2561_v10 }
  0xd1   :  { %v483_v28 = vadd.f32 %v402_v26, %v259_v24  ;;  %v482_v29 = vadd.f32 %v397_v27, %v258_v25  ;;  %1174 = vperm.xlu1 %2535, %v1112_v22   ;;  %1169 = vperm.xlu0 %2534, %v1111_v23  }
  0xd3   :  { %v515_v32 = vmax.f32 %v483_v28, 0.0  ;;  %v514_v33 = vmax.f32 %v482_v29, 0.0  ;;  %v1130_v28 = vld [vmem:[%s4071_s6 + $0xc8] sm:$0xff]  ;;  %v1129_v29 = vld [vmem:[%s4071_s6 + $0xc0] sm:$0xff] }
  0xd4   :  { %v182_v34 = vpop.permute.xlu1 %181  ;;  %v177_v35 = vpop.permute.xlu0 %176 }
  0xd5   :  { %1184 = vperm.xlu1 %2535, %v1114_v30   ;;  %1179 = vperm.xlu0 %2534, %v1113_v31   ;;  %v2383_v36 = vpack.c.bf16 %v515_v32, %v514_v33  ;;  %v261_v39 = vmul.f32 %v2823_v3, %v182_v34  ;;  %v260_v40 = vmul.f32 %v2823_v3, %v177_v35  ;;  %v1132_v35 = vld [vmem:[%s4071_s6 + $0xd8] sm:$0xff] }
  0xd7   :  { %2384 = vmatpush1.bf16.msra.mxu0 %v2383_v36  ;;  %2524 = vmatpush1.bf16.msra.mxu1 %v2383_v36  ;;  %v1131_v36 = vld [vmem:[%s4071_s6 + $0xd0] sm:$0xff] }
  0xd8   :  { %v412_v41 = vpop.permute.xlu1 %411  ;;  %v407_v42 = vpop.permute.xlu0 %406  ;;  %2385 = vmatprep.subr.bf16.mxu0 %v2561_v10  ;;  %2509 = vmatprep.subr.bf16.mxu1 %v2561_v10 }
  0xd9   :  { %v485_v43 = vadd.f32 %v412_v41, %v261_v39  ;;  %v484_v44 = vadd.f32 %v407_v42, %v260_v40  ;;  %1194 = vperm.xlu1 %2535, %v1116_v37   ;;  %1189 = vperm.xlu0 %2534, %v1115_v38  }
  0xdb   :  { %v517_v47 = vmax.f32 %v485_v43, 0.0  ;;  %v516_v48 = vmax.f32 %v484_v44, 0.0  ;;  %v1134_v43 = vld [vmem:[%s4071_s6 + $0xe8] sm:$0xff]  ;;  %v1133_v44 = vld [vmem:[%s4071_s6 + $0xe0] sm:$0xff] }
  0xdc   :  { %v192_v49 = vpop.permute.xlu1 %191  ;;  %v187_v50 = vpop.permute.xlu0 %186 }
  0xdd   :  { %1204 = vperm.xlu1 %2535, %v1118_v45   ;;  %1199 = vperm.xlu0 %2534, %v1117_v46   ;;  %v2386_v51 = vpack.c.bf16 %v517_v47, %v516_v48  ;;  %v263_v54 = vmul.f32 %v2823_v3, %v192_v49  ;;  %v262_v55 = vmul.f32 %v2823_v3, %v187_v50  ;;  %v1136_v50 = vld [vmem:[%s4071_s6 + $0xf8] sm:$0xff] }
  0xdf   :  { %2387 = vmatpush1.bf16.msra.mxu0 %v2386_v51  ;;  %2525 = vmatpush1.bf16.msra.mxu1 %v2386_v51  ;;  %v1135_v51 = vld [vmem:[%s4071_s6 + $0xf0] sm:$0xff] }
  0xe0   :  { %v422_v56 = vpop.permute.xlu1 %421  ;;  %v417_v57 = vpop.permute.xlu0 %416  ;;  %2388 = vmatprep.subr.bf16.mxu0 %v2561_v10  ;;  %2510 = vmatprep.subr.bf16.mxu1 %v2561_v10 }
  0xe1   :  { %v487_v58 = vadd.f32 %v422_v56, %v263_v54  ;;  %v486_v59 = vadd.f32 %v417_v57, %v262_v55  ;;  %1214 = vperm.xlu1 %2535, %v1120_v52   ;;  %1209 = vperm.xlu0 %2534, %v1119_v53  }
  0xe3   :  { %v519_v62 = vmax.f32 %v487_v58, 0.0  ;;  %v518_v63 = vmax.f32 %v486_v59, 0.0  ;;  %v1619_v58 = vld [vmem:[%s4073_s8 + $0x8] sm:$0xff] }
  0xe4   :  { %v202_v0 = vpop.permute.xlu1 %201  ;;  %v197_v1 = vpop.permute.xlu0 %196 }
  0xe5   :  { %1224 = vperm.xlu1 %2535, %v1122_v60   ;;  %1219 = vperm.xlu0 %2534, %v1121_v61   ;;  %v2389_v2 = vpack.c.bf16 %v519_v62, %v518_v63  ;;  %v265_v6 = vmul.f32 %v2823_v3, %v202_v0  ;;  %v264_v7 = vmul.f32 %v2823_v3, %v197_v1  ;;  %v1621_v62 = vld [vmem:[%s4073_s8 + $0x18] sm:$0xff]  ;;  %v1620_v63 = vld [vmem:[%s4073_s8 + $0x10] sm:$0xff]  ;;  %v528_v0 = vld [vmem:[%s4068_s3] sm:$0xff] }
  0xe6   :  { %v560_v1 = vld [vmem:[%s4068_s3 + $0x100] sm:$0xff] }
  0xe7   :  { %2390 = vmatpush1.bf16.msra.mxu0 %v2389_v2  ;;  %2526 = vmatpush1.bf16.msra.mxu1 %v2389_v2  ;;  %v531_v2 = vld [vmem:[%s4068_s3 + $0x18] sm:$0xff] }
  0xe8   :  { %v432_v8 = vpop.permute.xlu1 %431  ;;  %v427_v9 = vpop.permute.xlu0 %426  ;;  %2391 = vmatprep.subr.bf16.mxu0 %v2561_v10  ;;  %2511 = vmatprep.subr.bf16.mxu1 %v2561_v10 }
  0xe9   :  { %v489_v11 = vadd.f32 %v432_v8, %v265_v6  ;;  %v488_v12 = vadd.f32 %v427_v9, %v264_v7  ;;  %1234 = vperm.xlu1 %2535, %v1124_v4   ;;  %1229 = vperm.xlu0 %2534, %v1123_v5   ;;  %v563_v4 = vld [vmem:[%s4068_s3 + $0x118] sm:$0xff]  ;;  %v1623_v5 = vld [vmem:[%s4073_s8 + $0x28] sm:$0xff]  ;;  %v1622_v6 = vld [vmem:[%s4073_s8 + $0x20] sm:$0xff] }
  0xea   :  { %v530_v7 = vld [vmem:[%s4068_s3 + $0x10] sm:$0xff]  ;;  %v533_v9 = vld [vmem:[%s4068_s3 + $0x28] sm:$0xff] }
  0xeb   :  { %v521_v15 = vmax.f32 %v489_v11, 0.0  ;;  %v520_v16 = vmax.f32 %v488_v12, 0.0  ;;  %v562_v8 = vld [vmem:[%s4068_s3 + $0x110] sm:$0xff]  ;;  %v565_v11 = vld [vmem:[%s4068_s3 + $0x128] sm:$0xff]  ;;  %v1625_v12 = vld [vmem:[%s4073_s8 + $0x38] sm:$0xff] }
  0xec   :  { %v212_v17 = vpop.permute.xlu1 %211  ;;  %v207_v18 = vpop.permute.xlu0 %206 }
  0xed   :  { %1244 = vperm.xlu1 %2535, %v1126_v13   ;;  %1239 = vperm.xlu0 %2534, %v1125_v14   ;;  %v2392_v19 = vpack.c.bf16 %v521_v15, %v520_v16  ;;  %v267_v22 = vmul.f32 %v2823_v3, %v212_v17  ;;  %v266_v23 = vmul.f32 %v2823_v3, %v207_v18  ;;  %v1624_v13 = vld [vmem:[%s4073_s8 + $0x30] sm:$0xff]  ;;  %v532_v14 = vld [vmem:[%s4068_s3 + $0x20] sm:$0xff]  ;;  %v535_v16 = vld [vmem:[%s4068_s3 + $0x38] sm:$0xff] }
  0xee   :  { %v564_v15 = vld [vmem:[%s4068_s3 + $0x120] sm:$0xff]  ;;  %v567_v17 = vld [vmem:[%s4068_s3 + $0x138] sm:$0xff]  ;;  %v1627_v18 = vld [vmem:[%s4073_s8 + $0x48] sm:$0xff] }
  0xef   :  { %2393 = vmatpush1.bf16.msra.mxu0 %v2392_v19  ;;  %2527 = vmatpush1.bf16.msra.mxu1 %v2392_v19  ;;  %v1626_v19 = vld [vmem:[%s4073_s8 + $0x40] sm:$0xff] }
  0xf0   :  { %v442_v24 = vpop.permute.xlu1 %441  ;;  %v437_v25 = vpop.permute.xlu0 %436  ;;  %2394 = vmatprep.subr.bf16.mxu0 %v2561_v10  ;;  %2512 = vmatprep.subr.bf16.mxu1 %v2561_v10 }
  0xf1   :  { %v491_v26 = vadd.f32 %v442_v24, %v267_v22  ;;  %v490_v27 = vadd.f32 %v437_v25, %v266_v23  ;;  %1254 = vperm.xlu1 %2535, %v1128_v20   ;;  %1249 = vperm.xlu0 %2534, %v1127_v21   ;;  %v534_v20 = vld [vmem:[%s4068_s3 + $0x30] sm:$0xff]  ;;  %v537_v22 = vld [vmem:[%s4068_s3 + $0x48] sm:$0xff]  ;;  %v1629_v24 = vld [vmem:[%s4073_s8 + $0x58] sm:$0xff] }
  0xf2   :  { %v566_v21 = vld [vmem:[%s4068_s3 + $0x130] sm:$0xff]  ;;  %v569_v23 = vld [vmem:[%s4068_s3 + $0x148] sm:$0xff] }
  0xf3   :  { %v523_v30 = vmax.f32 %v491_v26, 0.0  ;;  %v522_v31 = vmax.f32 %v490_v27, 0.0  ;;  %v1628_v25 = vld [vmem:[%s4073_s8 + $0x50] sm:$0xff]  ;;  %v536_v26 = vld [vmem:[%s4068_s3 + $0x40] sm:$0xff] }
  0xf4   :  { %v222_v32 = vpop.permute.xlu1 %221  ;;  %v217_v33 = vpop.permute.xlu0 %216  ;;  %v568_v27 = vld [vmem:[%s4068_s3 + $0x140] sm:$0xff] }
  0xf5   :  { %1264 = vperm.xlu1 %2535, %v1130_v28   ;;  %1259 = vperm.xlu0 %2534, %v1129_v29   ;;  %v2395_v34 = vpack.c.bf16 %v523_v30, %v522_v31  ;;  %v269_v37 = vmul.f32 %v2823_v3, %v222_v32  ;;  %v268_v38 = vmul.f32 %v2823_v3, %v217_v33  ;;  %v539_v28 = vld [vmem:[%s4068_s3 + $0x58] sm:$0xff]  ;;  %v1631_v30 = vld [vmem:[%s4073_s8 + $0x68] sm:$0xff]  ;;  %v1630_v31 = vld [vmem:[%s4073_s8 + $0x60] sm:$0xff] }
  0xf6   :  { %v571_v29 = vld [vmem:[%s4068_s3 + $0x158] sm:$0xff]  ;;  %v538_v32 = vld [vmem:[%s4068_s3 + $0x50] sm:$0xff] }
  0xf7   :  { %2396 = vmatpush1.bf16.msra.mxu0 %v2395_v34  ;;  %2528 = vmatpush1.bf16.msra.mxu1 %v2395_v34  ;;  %v570_v33 = vld [vmem:[%s4068_s3 + $0x150] sm:$0xff]  ;;  %v541_v34 = vld [vmem:[%s4068_s3 + $0x68] sm:$0xff] }
  0xf8   :  { %v452_v39 = vpop.permute.xlu1 %451  ;;  %v447_v40 = vpop.permute.xlu0 %446  ;;  %2397 = vmatprep.subr.bf16.mxu0 %v2561_v10  ;;  %2513 = vmatprep.subr.bf16.mxu1 %v2561_v10 }
  0xf9   :  { %v493_v41 = vadd.f32 %v452_v39, %v269_v37  ;;  %v492_v42 = vadd.f32 %v447_v40, %v268_v38  ;;  %1274 = vperm.xlu1 %2535, %v1132_v35   ;;  %1269 = vperm.xlu0 %2534, %v1131_v36   ;;  %v573_v35 = vld [vmem:[%s4068_s3 + $0x168] sm:$0xff]  ;;  %v1633_v36 = vld [vmem:[%s4073_s8 + $0x78] sm:$0xff]  ;;  %v1632_v37 = vld [vmem:[%s4073_s8 + $0x70] sm:$0xff] }
  0xfa   :  { %v540_v38 = vld [vmem:[%s4068_s3 + $0x60] sm:$0xff]  ;;  %v543_v40 = vld [vmem:[%s4068_s3 + $0x78] sm:$0xff] }
  0xfb   :  { %v525_v45 = vmax.f32 %v493_v41, 0.0  ;;  %v524_v46 = vmax.f32 %v492_v42, 0.0  ;;  %v572_v39 = vld [vmem:[%s4068_s3 + $0x160] sm:$0xff]  ;;  %v575_v41 = vld [vmem:[%s4068_s3 + $0x178] sm:$0xff]  ;;  %v1635_v42 = vld [vmem:[%s4073_s8 + $0x88] sm:$0xff] }
  0xfc   :  { %v232_v47 = vpop.permute.xlu1 %231  ;;  %v227_v48 = vpop.permute.xlu0 %226 }
  0xfd   :  { %1284 = vperm.xlu1 %2535, %v1134_v43   ;;  %1279 = vperm.xlu0 %2534, %v1133_v44   ;;  %v2398_v49 = vpack.c.bf16 %v525_v45, %v524_v46  ;;  %v271_v52 = vmul.f32 %v2823_v3, %v232_v47  ;;  %v270_v53 = vmul.f32 %v2823_v3, %v227_v48  ;;  %v1618_v3 = vld [vmem:[%s4073_s8] sm:$0xff]  ;;  %v542_v44 = vld [vmem:[%s4068_s3 + $0x70] sm:$0xff]  ;;  %v545_v46 = vld [vmem:[%s4068_s3 + $0x88] sm:$0xff] }
  0xfe   :  { %v1634_v43 = vld [vmem:[%s4073_s8 + $0x80] sm:$0xff]  ;;  %v574_v45 = vld [vmem:[%s4068_s3 + $0x170] sm:$0xff]  ;;  %v577_v47 = vld [vmem:[%s4068_s3 + $0x188] sm:$0xff] }
  0xff   :  { %2399 = vmatpush1.bf16.msra.mxu0 %v2398_v49  ;;  %2529 = vmatpush1.bf16.msra.mxu1 %v2398_v49  ;;  %v1637_v48 = vld [vmem:[%s4073_s8 + $0x98] sm:$0xff]  ;;  %v1636_v49 = vld [vmem:[%s4073_s8 + $0x90] sm:$0xff] }
 0x100   :  { %v462_v54 = vpop.permute.xlu1 %461  ;;  %v457_v55 = vpop.permute.xlu0 %456  ;;  %2400 = vmatprep.subr.bf16.mxu0 %v2561_v10  ;;  %2514 = vmatprep.subr.bf16.mxu1 %v2561_v10 }
 0x101   :  { %v495_v56 = vadd.f32 %v462_v54, %v271_v52  ;;  %v494_v57 = vadd.f32 %v457_v55, %v270_v53  ;;  %1294 = vperm.xlu1 %2535, %v1136_v50   ;;  %1289 = vperm.xlu0 %2534, %v1135_v51   ;;  %v544_v50 = vld [vmem:[%s4068_s3 + $0x80] sm:$0xff]  ;;  %v547_v52 = vld [vmem:[%s4068_s3 + $0x98] sm:$0xff]  ;;  %v1639_v54 = vld [vmem:[%s4073_s8 + $0xa8] sm:$0xff] }
 0x102   :  { %v576_v51 = vld [vmem:[%s4068_s3 + $0x180] sm:$0xff]  ;;  %v579_v53 = vld [vmem:[%s4068_s3 + $0x198] sm:$0xff] }
 0x103   :  { %v527_v59 = vmax.f32 %v495_v56, 0.0  ;;  %v526_v60 = vmax.f32 %v494_v57, 0.0  ;;  %v1638_v55 = vld [vmem:[%s4073_s8 + $0xa0] sm:$0xff]  ;;  %v546_v57 = vld [vmem:[%s4068_s3 + $0x90] sm:$0xff] }
 0x104   :  { %v3261_v56 = vpop.permute.xlu0 %626 }
 0x105   :  { %1657 = vperm.xlu1 %2535, %v1619_v58   ;;  %1652 = vperm.xlu0 %2534, %v1618_v3   ;;  %v2401_v61 = vpack.c.bf16 %v527_v59, %v526_v60  ;;  %v578_v58 = vld [vmem:[%s4068_s3 + $0x190] sm:$0xff]  ;;  %v549_v3 = vld [vmem:[%s4068_s3 + $0xa8] sm:$0xff]  ;;  %v3275_v60 = vpop.permute.xlu1 %631 }
 0x106   :  { %v581_v59 = vld [vmem:[%s4068_s3 + $0x1a8] sm:$0xff] }
 0x107   :  { %2402 = vmatpush1.bf16.msra.mxu0 %v2401_v61  ;;  %2530 = vmatpush1.bf16.msra.mxu1 %v2401_v61  ;;  %v1641_v61 = vld [vmem:[%s4073_s8 + $0xb8] sm:$0xff] }
 0x108   :  { %2403 = vmatprep.subr.bf16.mxu1 %v2561_v10  ;;  %2451 = vmatprep.subr.bf16.mxu0 %v2561_v10 }
 0x109   :  { %1667 = vperm.xlu1 %2535, %v1621_v62   ;;  %1662 = vperm.xlu0 %2534, %v1620_v63   ;;  %v1640_v62 = vld [vmem:[%s4073_s8 + $0xb0] sm:$0xff]  ;;  %v548_v63 = vld [vmem:[%s4068_s3 + $0xa0] sm:$0xff] }
 0x10a   :  { %849 = vmatmul.mubr.f32.vlgmr.msra.gmra.mrb[0].mxu0 %v528_v0  ;;  %929 = vmatmul.mubr.f32.vlgmr.msra.gmra.mrb[0].mxu1 %v560_v1  ;;  %v580_v0 = vld [vmem:[%s4068_s3 + $0x1a0] sm:$0xff]  ;;  %v551_v1 = vld [vmem:[%s4068_s3 + $0xb8] sm:$0xff] }
 0x10b   :  { %853 = vmatprep.mubr.f32.mxu0 %v531_v2  ;;  %933 = vmatprep.mubr.f32.mxu1 %v563_v4  ;;  %v583_v2 = vld [vmem:[%s4068_s3 + $0x1b8] sm:$0xff]  ;;  %v3295_v4 = vpop.permute.xlu0 %636 }
 0x10d   :  { %1677 = vperm.xlu1 %2535, %v1623_v5   ;;  %1672 = vperm.xlu0 %2534, %v1622_v6   ;;  %v1643_v5 = vld [vmem:[%s4073_s8 + $0xc8] sm:$0xff]  ;;  %v1642_v6 = vld [vmem:[%s4073_s8 + $0xc0] sm:$0xff] }
 0x10e   :  { %854 = vmatmul.mubr.f32.gmra.mrb[2].mxu0 %v530_v7  ;;  %934 = vmatmul.mubr.f32.gmra.mrb[2].mxu1 %v562_v8  ;;  %v3303_v7 = vpop.permute.xlu1 %641  ;;  %v550_v8 = vld [vmem:[%s4068_s3 + $0xb0] sm:$0xff] }
 0x10f   :  { %858 = vmatprep.mubr.f32.mxu0 %v533_v9  ;;  %938 = vmatprep.mubr.f32.mxu1 %v565_v11  ;;  %v582_v9 = vld [vmem:[%s4068_s3 + $0x1b0] sm:$0xff]  ;;  %v553_v11 = vld [vmem:[%s4068_s3 + $0xc8] sm:$0xff] }
 0x111   :  { %1687 = vperm.xlu1 %2535, %v1625_v12   ;;  %1682 = vperm.xlu0 %2534, %v1624_v13   ;;  %v585_v12 = vld [vmem:[%s4068_s3 + $0x1c8] sm:$0xff]  ;;  %v1645_v13 = vld [vmem:[%s4073_s8 + $0xd8] sm:$0xff] }
 0x112   :  { %859 = vmatmul.mubr.f32.gmra.mrb[4].mxu0 %v532_v14  ;;  %939 = vmatmul.mubr.f32.gmra.mrb[4].mxu1 %v564_v15  ;;  %v1644_v14 = vld [vmem:[%s4073_s8 + $0xd0] sm:$0xff]  ;;  %v3323_v15 = vpop.permute.xlu0 %646 }
 0x113   :  { %863 = vmatprep.mubr.f32.mxu0 %v535_v16  ;;  %943 = vmatprep.mubr.f32.mxu1 %v567_v17  ;;  %v552_v16 = vld [vmem:[%s4068_s3 + $0xc0] sm:$0xff] }
 0x114   :  { %v584_v17 = vld [vmem:[%s4068_s3 + $0x1c0] sm:$0xff] }
 0x115   :  { %1697 = vperm.xlu1 %2535, %v1627_v18   ;;  %1692 = vperm.xlu0 %2534, %v1626_v19   ;;  %v555_v18 = vld [vmem:[%s4068_s3 + $0xd8] sm:$0xff] }
 0x116   :  { %864 = vmatmul.mubr.f32.gmra.mrb[6].mxu0 %v534_v20  ;;  %944 = vmatmul.mubr.f32.gmra.mrb[6].mxu1 %v566_v21  ;;  %v587_v19 = vld [vmem:[%s4068_s3 + $0x1d8] sm:$0xff]  ;;  %v3337_v20 = vpop.permute.xlu1 %651  ;;  %v2067_v21 = vld [vmem:[%s4074_s9] sm:$0xff] }
 0x117   :  { %868 = vmatprep.mubr.f32.mxu0 %v537_v22  ;;  %948 = vmatprep.mubr.f32.mxu1 %v569_v23  ;;  %v1646_v22 = vld [vmem:[%s4073_s8 + $0xe0] sm:$0xff]  ;;  %v554_v23 = vld [vmem:[%s4068_s3 + $0xd0] sm:$0xff] }
 0x119   :  { %1707 = vperm.xlu1 %2535, %v1629_v24   ;;  %1702 = vperm.xlu0 %2534, %v1628_v25   ;;  %v586_v24 = vld [vmem:[%s4068_s3 + $0x1d0] sm:$0xff]  ;;  %v557_v25 = vld [vmem:[%s4068_s3 + $0xe8] sm:$0xff] }
 0x11a   :  { %869 = vmatmul.mubr.f32.gmra.mrb[8].mxu0 %v536_v26  ;;  %949 = vmatmul.mubr.f32.gmra.mrb[8].mxu1 %v568_v27  ;;  %v589_v26 = vld [vmem:[%s4068_s3 + $0x1e8] sm:$0xff]  ;;  %v3357_v27 = vpop.permute.xlu0 %656 }
 0x11b   :  { %873 = vmatprep.mubr.f32.mxu0 %v539_v28  ;;  %953 = vmatprep.mubr.f32.mxu1 %v571_v29  ;;  %v2069_v28 = vld [vmem:[%s4074_s9 + $0x10] sm:$0xff]  ;;  %v2068_v29 = vld [vmem:[%s4074_s9 + $0x8] sm:$0xff] }
 0x11d   :  { %1717 = vperm.xlu1 %2535, %v1631_v30   ;;  %1712 = vperm.xlu0 %2534, %v1630_v31   ;;  %v3365_v30 = vpop.permute.xlu1 %661  ;;  %v556_v31 = vld [vmem:[%s4068_s3 + $0xe0] sm:$0xff] }
 0x11e   :  { %874 = vmatmul.mubr.f32.gmra.mrb[10].mxu0 %v538_v32  ;;  %954 = vmatmul.mubr.f32.gmra.mrb[10].mxu1 %v570_v33  ;;  %v588_v32 = vld [vmem:[%s4068_s3 + $0x1e0] sm:$0xff]  ;;  %v559_v33 = vld [vmem:[%s4068_s3 + $0xf8] sm:$0xff] }
 0x11f   :  { %878 = vmatprep.mubr.f32.mxu0 %v541_v34  ;;  %958 = vmatprep.mubr.f32.mxu1 %v573_v35  ;;  %v591_v34 = vld [vmem:[%s4068_s3 + $0x1f8] sm:$0xff]  ;;  %v2071_v35 = vld [vmem:[%s4074_s9 + $0x20] sm:$0xff] }
 0x121   :  { %1727 = vperm.xlu1 %2535, %v1633_v36   ;;  %1722 = vperm.xlu0 %2534, %v1632_v37   ;;  %v2070_v36 = vld [vmem:[%s4074_s9 + $0x18] sm:$0xff]  ;;  %v3385_v37 = vpop.permute.xlu0 %666 }
 0x122   :  { %879 = vmatmul.mubr.f32.gmra.mrb[12].mxu0 %v540_v38  ;;  %959 = vmatmul.mubr.f32.gmra.mrb[12].mxu1 %v572_v39  ;;  %v558_v38 = vld [vmem:[%s4068_s3 + $0xf0] sm:$0xff] }
 0x123   :  { %883 = vmatprep.mubr.f32.mxu0 %v543_v40  ;;  %963 = vmatprep.mubr.f32.mxu1 %v575_v41  ;;  %v590_v39 = vld [vmem:[%s4068_s3 + $0x1f0] sm:$0xff]  ;;  %v3393_v40 = vpop.permute.xlu1 %671 }
 0x124   :  { %v2073_v41 = vld [vmem:[%s4074_s9 + $0x30] sm:$0xff] }
 0x125   :  { %1737 = vperm.xlu1 %2535, %v1635_v42   ;;  %1732 = vperm.xlu0 %2534, %v1634_v43   ;;  %v2072_v42 = vld [vmem:[%s4074_s9 + $0x28] sm:$0xff]  ;;  %v3401_v43 = vpop.permute.xlu0 %676 }
 0x126   :  { %884 = vmatmul.mubr.f32.gmra.mrb[14].mxu0 %v542_v44  ;;  %964 = vmatmul.mubr.f32.gmra.mrb[14].mxu1 %v574_v45  ;;  %v2075_v44 = vld [vmem:[%s4074_s9 + $0x40] sm:$0xff]  ;;  %v2074_v45 = vld [vmem:[%s4074_s9 + $0x38] sm:$0xff] }
 0x127   :  { %888 = vmatprep.mubr.f32.mxu0 %v545_v46  ;;  %968 = vmatprep.mubr.f32.mxu1 %v577_v47  ;;  %v3409_v46 = vpop.permute.xlu1 %681  ;;  %v2077_v47 = vld [vmem:[%s4074_s9 + $0x50] sm:$0xff] }
 0x129   :  { %1747 = vperm.xlu1 %2535, %v1637_v48   ;;  %1742 = vperm.xlu0 %2534, %v1636_v49   ;;  %v2076_v48 = vld [vmem:[%s4074_s9 + $0x48] sm:$0xff]  ;;  %v3417_v49 = vpop.permute.xlu0 %686 }
 0x12a   :  { %889 = vmatmul.mubr.f32.gmra.mrb[16].mxu0 %v544_v50  ;;  %969 = vmatmul.mubr.f32.gmra.mrb[16].mxu1 %v576_v51  ;;  %v2079_v51 = vld [vmem:[%s4074_s9 + $0x60] sm:$0xff] }
 0x12b   :  { %893 = vmatprep.mubr.f32.mxu0 %v547_v52  ;;  %973 = vmatprep.mubr.f32.mxu1 %v579_v53  ;;  %v3419_v50 = vpop.permute.xlu1 %691  ;;  %v2078_v52 = vld [vmem:[%s4074_s9 + $0x58] sm:$0xff] }
 0x12d   :  { %1757 = vperm.xlu1 %2535, %v1639_v54   ;;  %1752 = vperm.xlu0 %2534, %v1638_v55   ;;  %v3427_v53 = vpop.permute.xlu0 %696  ;;  %v2081_v54 = vld [vmem:[%s4074_s9 + $0x70] sm:$0xff]  ;;  %v2080_v55 = vld [vmem:[%s4074_s9 + $0x68] sm:$0xff] }
 0x12e   :  { %894 = vmatmul.mubr.f32.gmra.mrb[18].mxu0 %v546_v57  ;;  %974 = vmatmul.mubr.f32.gmra.mrb[18].mxu1 %v578_v58  ;;  %v2083_v58 = vld [vmem:[%s4074_s9 + $0x80] sm:$0xff] }
 0x12f   :  { %898 = vmatprep.mubr.f32.mxu0 %v549_v3  ;;  %978 = vmatprep.mubr.f32.mxu1 %v581_v59  ;;  %v3435_v57 = vpop.permute.xlu1 %701  ;;  %v2082_v3 = vld [vmem:[%s4074_s9 + $0x78] sm:$0xff] }
 0x131   :  { %1767 = vperm.xlu1 %2535, %v1641_v61   ;;  %1762 = vperm.xlu0 %2534, %v1640_v62   ;;  %v707_v59 = vpop.permute.xlu0 %706  ;;  %v2085_v62 = vld [vmem:[%s4074_s9 + $0x90] sm:$0xff] }
 0x132   :  { %899 = vmatmul.mubr.f32.gmra.mrb[20].mxu0 %v548_v63  ;;  %979 = vmatmul.mubr.f32.gmra.mrb[20].mxu1 %v580_v0  ;;  %v2084_v63 = vld [vmem:[%s4074_s9 + $0x88] sm:$0xff] }
 0x133   :  { %903 = vmatprep.mubr.f32.mxu0 %v551_v1  ;;  %983 = vmatprep.mubr.f32.mxu1 %v583_v2  ;;  %v3443_v61 = vpop.permute.xlu1 %711  ;;  %v2087_v1 = vld [vmem:[%s4074_s9 + $0xa0] sm:$0xff]  ;;  %v2086_v2 = vld [vmem:[%s4074_s9 + $0x98] sm:$0xff] }
 0x135   :  { %1777 = vperm.xlu1 %2535, %v1643_v5   ;;  %1772 = vperm.xlu0 %2534, %v1642_v6   ;;  %v3451_v0 = vpop.permute.xlu0 %716  ;;  %v2089_v6 = vld [vmem:[%s4074_s9 + $0xb0] sm:$0xff] }
 0x136   :  { %904 = vmatmul.mubr.f32.gmra.mrb[22].mxu0 %v550_v8  ;;  %984 = vmatmul.mubr.f32.gmra.mrb[22].mxu1 %v582_v9  ;;  %v2088_v8 = vld [vmem:[%s4074_s9 + $0xa8] sm:$0xff] }
 0x137   :  { %908 = vmatprep.mubr.f32.mxu0 %v553_v11  ;;  %988 = vmatprep.mubr.f32.mxu1 %v585_v12  ;;  %v3459_v5 = vpop.permute.xlu1 %721  ;;  %v2091_v12 = vld [vmem:[%s4074_s9 + $0xc0] sm:$0xff] }
 0x139   :  { %1787 = vperm.xlu1 %2535, %v1645_v13   ;;  %1782 = vperm.xlu0 %2534, %v1644_v14   ;;  %v3467_v9 = vpop.permute.xlu0 %726  ;;  %v2090_v13 = vld [vmem:[%s4074_s9 + $0xb8] sm:$0xff] }
 0x13a   :  { %909 = vmatmul.mubr.f32.gmra.mrb[24].mxu0 %v552_v16  ;;  %989 = vmatmul.mubr.f32.gmra.mrb[24].mxu1 %v584_v17  ;;  %v2093_v16 = vld [vmem:[%s4074_s9 + $0xd0] sm:$0xff]  ;;  %v2092_v17 = vld [vmem:[%s4074_s9 + $0xc8] sm:$0xff] }
 0x13b   :  { %913 = vmatprep.mubr.f32.mxu0 %v555_v18  ;;  %993 = vmatprep.mubr.f32.mxu1 %v587_v19  ;;  %v3469_v11 = vpop.permute.xlu1 %731  ;;  %v2094_v19 = vld [vmem:[%s4074_s9 + $0xd8] sm:$0xff] }
 0x13d   :  { %2101 = vperm.xlu1 %2535, %v2067_v21   ;;  %1792 = vperm.xlu0 %2534, %v1646_v22   ;;  %v3477_v14 = vpop.permute.xlu0 %736  ;;  %v1647_v21 = vld [vmem:[%s4073_s8 + $0xe8] sm:$0xff] }
 0x13e   :  { %914 = vmatmul.mubr.f32.gmra.mrb[26].mxu0 %v554_v23  ;;  %994 = vmatmul.mubr.f32.gmra.mrb[26].mxu1 %v586_v24  ;;  %v2095_v24 = vld [vmem:[%s4074_s9 + $0xe0] sm:$0xff] }
 0x13f   :  { %918 = vmatprep.mubr.f32.mxu0 %v557_v25  ;;  %998 = vmatprep.mubr.f32.mxu1 %v589_v26  ;;  %v3485_v18 = vpop.permute.xlu1 %741  ;;  %v1648_v25 = vld [vmem:[%s4073_s8 + $0xf0] sm:$0xff] }
 0x141   :  { %2111 = vperm.xlu1 %2535, %v2069_v28   ;;  %2106 = vperm.xlu0 %2534, %v2068_v29   ;;  %v3493_v22 = vpop.permute.xlu0 %746  ;;  %v2096_v28 = vld [vmem:[%s4074_s9 + $0xe8] sm:$0xff]  ;;  %v1649_v29 = vld [vmem:[%s4073_s8 + $0xf8] sm:$0xff] }
 0x142   :  { %919 = vmatmul.mubr.f32.gmra.mrb[28].mxu0 %v556_v31  ;;  %999 = vmatmul.mubr.f32.gmra.mrb[28].mxu1 %v588_v32  ;;  %v2098_v32 = vld [vmem:[%s4074_s9 + $0xf8] sm:$0xff] }
 0x143   :  { %923 = vmatprep.mubr.f32.mxu0 %v559_v33  ;;  %1003 = vmatprep.mubr.f32.mxu1 %v591_v34  ;;  %v3495_v23 = vpop.permute.xlu1 %751  ;;  %v2097_v33 = vld [vmem:[%s4074_s9 + $0xf0] sm:$0xff] }
 0x145   :  { %2121 = vperm.xlu1 %2535, %v2071_v35   ;;  %2116 = vperm.xlu0 %2534, %v2070_v36   ;;  %v3503_v26 = vpop.permute.xlu0 %756  ;;  %v2328_v36 = vld [vmem:[#allocation2] sm:$0x1] }
 0x146   :  { %924 = vmatmul.mubr.f32.gmra.mrb[30].mxu0 %v558_v38  ;;  %1004 = vmatmul.mubr.f32.gmra.mrb[30].mxu1 %v590_v39  ;;  %v1042_v39 = vld [vmem:[%s4070_s5 + $0x8] sm:$0xff] }
 0x147   :  { %v3511_v31 = vpop.permute.xlu1 %761  ;;  %1361 = vmatprep.mubr.f32.mxu1 %v1042_v39 }
 0x149   :  { %2131 = vperm.xlu1 %2535, %v2073_v41   ;;  %2126 = vperm.xlu0 %2534, %v2072_v42   ;;  %v3519_v34 = vpop.permute.xlu0 %766 }
 0x14b   :  { %v3521_v35 = vpop.permute.xlu1 %771 }
 0x14d   :  { %2141 = vperm.xlu1 %2535, %v2075_v44   ;;  %2136 = vperm.xlu0 %2534, %v2074_v45   ;;  %v3523_v38 = vpop.permute.xlu0 %776 }
 0x151   :  { %2151 = vperm.xlu1 %2535, %v2077_v47   ;;  %2146 = vperm.xlu0 %2534, %v2076_v48  }
 0x155   :  { %2161 = vperm.xlu1 %2535, %v2079_v51   ;;  %2156 = vperm.xlu0 %2534, %v2078_v52  }
 0x159   :  { %2171 = vperm.xlu1 %2535, %v2081_v54   ;;  %2166 = vperm.xlu0 %2534, %v2080_v55  }
 0x15d   :  { %2181 = vperm.xlu1 %2535, %v2083_v58   ;;  %2176 = vperm.xlu0 %2534, %v2082_v3  }
 0x161   :  { %2191 = vperm.xlu1 %2535, %v2085_v62   ;;  %2186 = vperm.xlu0 %2534, %v2084_v63  }
 0x165   :  { %2201 = vperm.xlu1 %2535, %v2087_v1   ;;  %2196 = vperm.xlu0 %2534, %v2086_v2  }
 0x169   :  { %2211 = vperm.xlu1 %2535, %v2089_v6   ;;  %2206 = vperm.xlu0 %2534, %v2088_v8  }
 0x16d   :  { %2221 = vperm.xlu1 %2535, %v2091_v12   ;;  %2216 = vperm.xlu0 %2534, %v2090_v13  }
 0x171   :  { %2231 = vperm.xlu1 %2535, %v2093_v16   ;;  %2226 = vperm.xlu0 %2534, %v2092_v17  }
 0x175   :  { %2236 = vperm.xlu1 %2535, %v2094_v19   ;;  %1797 = vperm.xlu0 %2534, %v1647_v21  }
 0x179   :  { %2241 = vperm.xlu1 %2535, %v2095_v24   ;;  %1802 = vperm.xlu0 %2534, %v1648_v25  }
 0x17d   :  { %2246 = vperm.xlu1 %2535, %v2096_v28   ;;  %1807 = vperm.xlu0 %2534, %v1649_v29  }
 0x181   :  { %2256 = vperm.xlu1 %2535, %v2098_v32   ;;  %2251 = vperm.xlu0 %2534, %v2097_v33  }
 0x185   :  { %2331 = vperm.xlu0 %2534, %v2328_v36  }
 0x1dd   :  { %v850_v41 = vpop.f32.mrb[0].mxu0  ;;  %v930_v42 = vpop.f32.mrb[0].mxu1 }
 0x1de   :  { %v852_v44 = vpop.f32.mrb[1].mxu0  ;;  %v932_v45 = vpop.f32.mrb[1].mxu1  ;;  %v851_v47 = vadd.f32 %v850_v41, %v3261_v56  ;;  %v931_v48 = vadd.f32 %v930_v42, %v707_v59 }
 0x1e0   :  { %v1009_v62 = vmax.f32 %v851_v47, 0.0  ;;  %v1025_v63 = vmax.f32 %v931_v48, 0.0 }
 0x1e1   :  { %v855_v51 = vpop.f32.mrb[2].mxu0  ;;  %v935_v52 = vpop.f32.mrb[2].mxu1 }
 0x1e2   :  { %v856_v54 = vadd.f32 %v855_v51, %v3275_v60  ;;  %v936_v55 = vadd.f32 %v935_v52, %v3443_v61  ;;  %v857_v58 = vpop.f32.mrb[3].mxu0  ;;  %v937_v3 = vpop.f32.mrb[3].mxu1 }
 0x1e4   :  { %v1010_v1 = vmax.f32 %v856_v54, 0.0  ;;  %v1026_v2 = vmax.f32 %v936_v55, 0.0 }
 0x1e5   :  { %v860_v6 = vpop.f32.mrb[4].mxu0  ;;  %v940_v8 = vpop.f32.mrb[4].mxu1 }
 0x1e6   :  { %v2404_v12 = vpack.c.bf16 %v1010_v1, %v1009_v62  ;;  %v3531_v13 = vpack.c.bf16 %v1026_v2, %v1025_v63  ;;  %v862_v16 = vpop.f32.mrb[5].mxu0  ;;  %v942_v56 = vpop.f32.mrb[5].mxu1  ;;  %v861_v59 = vadd.f32 %v860_v6, %v3295_v4  ;;  %v941_v17 = vadd.f32 %v940_v8, %v3451_v0 }
 0x1e8   :  { %2405 = vmatpush1.bf16.msra.mxu1 %v2404_v12  ;;  %v1011_v28 = vmax.f32 %v861_v59, 0.0  ;;  %v1027_v29 = vmax.f32 %v941_v17, 0.0 }
 0x1e9   :  { %v865_v60 = vpop.f32.mrb[6].mxu0  ;;  %v945_v61 = vpop.f32.mrb[6].mxu1  ;;  %2406 = vmatprep.subr.bf16.mxu1 %v2561_v10 }
 0x1ea   :  { %v866_v19 = vadd.f32 %v865_v60, %v3303_v7  ;;  %v946_v21 = vadd.f32 %v945_v61, %v3459_v5  ;;  %v867_v24 = vpop.f32.mrb[7].mxu0  ;;  %v947_v25 = vpop.f32.mrb[7].mxu1 }
 0x1ec   :  { %v1012_v32 = vmax.f32 %v866_v19, 0.0  ;;  %v1028_v33 = vmax.f32 %v946_v21, 0.0 }
 0x1ed   :  { %v870_v36 = vpop.f32.mrb[8].mxu0  ;;  %v950_v39 = vpop.f32.mrb[8].mxu1 }
 0x1ee   :  { %v2407_v4 = vpack.c.bf16 %v1012_v32, %v1011_v28  ;;  %v3538_v41 = vpack.c.bf16 %v1028_v33, %v1027_v29  ;;  %v872_v0 = vpop.f32.mrb[9].mxu0  ;;  %v952_v42 = vpop.f32.mrb[9].mxu1  ;;  %v871_v44 = vadd.f32 %v870_v36, %v3323_v15  ;;  %v951_v45 = vadd.f32 %v950_v39, %v3467_v9 }
 0x1f0   :  { %2408 = vmatpush1.bf16.msra.mxu1 %v2407_v4  ;;  %v1013_v54 = vmax.f32 %v871_v44, 0.0  ;;  %v1029_v55 = vmax.f32 %v951_v45, 0.0 }
 0x1f1   :  { %v875_v7 = vpop.f32.mrb[10].mxu0  ;;  %v955_v5 = vpop.f32.mrb[10].mxu1  ;;  %2409 = vmatprep.subr.bf16.mxu1 %v2561_v10 }
 0x1f2   :  { %v876_v47 = vadd.f32 %v875_v7, %v3337_v20  ;;  %v956_v48 = vadd.f32 %v955_v5, %v3469_v11  ;;  %v877_v51 = vpop.f32.mrb[11].mxu0  ;;  %v957_v52 = vpop.f32.mrb[11].mxu1 }
 0x1f4   :  { %v1014_v58 = vmax.f32 %v876_v47, 0.0  ;;  %v1030_v3 = vmax.f32 %v956_v48, 0.0 }
 0x1f5   :  { %v880_v62 = vpop.f32.mrb[12].mxu0  ;;  %v960_v63 = vpop.f32.mrb[12].mxu1 }
 0x1f6   :  { %v2410_v15 = vpack.c.bf16 %v1014_v58, %v1013_v54  ;;  %v3545_v1 = vpack.c.bf16 %v1030_v3, %v1029_v55  ;;  %v882_v9 = vpop.f32.mrb[13].mxu0  ;;  %v962_v2 = vpop.f32.mrb[13].mxu1  ;;  %v881_v6 = vadd.f32 %v880_v62, %v3357_v27  ;;  %v961_v8 = vadd.f32 %v960_v63, %v3477_v14 }
 0x1f8   :  { %2411 = vmatpush1.bf16.msra.mxu1 %v2410_v15  ;;  %v1015_v17 = vmax.f32 %v881_v6, 0.0  ;;  %v1031_v60 = vmax.f32 %v961_v8, 0.0 }
 0x1f9   :  { %v885_v20 = vpop.f32.mrb[14].mxu0  ;;  %v965_v11 = vpop.f32.mrb[14].mxu1  ;;  %2412 = vmatprep.subr.bf16.mxu1 %v2561_v10 }
 0x1fa   :  { %v886_v12 = vadd.f32 %v885_v20, %v3365_v30  ;;  %v966_v16 = vadd.f32 %v965_v11, %v3485_v18  ;;  %v887_v56 = vpop.f32.mrb[15].mxu0  ;;  %v967_v59 = vpop.f32.mrb[15].mxu1 }
 0x1fc   :  { %v1016_v61 = vmax.f32 %v886_v12, 0.0  ;;  %v1032_v19 = vmax.f32 %v966_v16, 0.0 }
 0x1fd   :  { %v890_v21 = vpop.f32.mrb[16].mxu0  ;;  %v970_v24 = vpop.f32.mrb[16].mxu1 }
 0x1fe   :  { %v2413_v27 = vpack.c.bf16 %v1016_v61, %v1015_v17  ;;  %v3552_v25 = vpack.c.bf16 %v1032_v19, %v1031_v60  ;;  %v892_v14 = vpop.f32.mrb[17].mxu0  ;;  %v972_v28 = vpop.f32.mrb[17].mxu1  ;;  %v891_v29 = vadd.f32 %v890_v21, %v3385_v37  ;;  %v971_v32 = vadd.f32 %v970_v24, %v3493_v22 }
 0x200   :  { %2414 = vmatpush1.bf16.msra.mxu1 %v2413_v27  ;;  %v1017_v0 = vmax.f32 %v891_v29, 0.0  ;;  %v1033_v42 = vmax.f32 %v971_v32, 0.0  ;;  %v782_v29 = vpop.permute.xlu1 %781 }
 0x201   :  { %v895_v30 = vpop.f32.mrb[18].mxu0  ;;  %v975_v18 = vpop.f32.mrb[18].mxu1  ;;  %2415 = vmatprep.subr.bf16.mxu1 %v2561_v10 }
 0x202   :  { %v896_v33 = vadd.f32 %v895_v30, %v3393_v40  ;;  %v976_v36 = vadd.f32 %v975_v18, %v3495_v23  ;;  %v897_v39 = vpop.f32.mrb[19].mxu0  ;;  %v977_v4 = vpop.f32.mrb[19].mxu1 }
 0x204   :  { %v1018_v44 = vmax.f32 %v896_v33, 0.0  ;;  %v1034_v45 = vmax.f32 %v976_v36, 0.0 }
 0x205   :  { %v900_v7 = vpop.f32.mrb[20].mxu0  ;;  %v980_v5 = vpop.f32.mrb[20].mxu1 }
 0x206   :  { %v2416_v37 = vpack.c.bf16 %v1018_v44, %v1017_v0  ;;  %v3559_v47 = vpack.c.bf16 %v1034_v45, %v1033_v42  ;;  %v902_v22 = vpop.f32.mrb[21].mxu0  ;;  %v982_v48 = vpop.f32.mrb[21].mxu1  ;;  %v901_v51 = vadd.f32 %v900_v7, %v3401_v43  ;;  %v981_v52 = vadd.f32 %v980_v5, %v3503_v26  ;;  %v1050_v5 = vld [vmem:[%s4070_s5 + $0x48] sm:$0xff] }
 0x207   :  { %v1051_v22 = vld [vmem:[%s4070_s5 + $0x50] sm:$0xff]  ;;  %v1054_v48 = vld [vmem:[%s4070_s5 + $0x68] sm:$0xff] }
 0x208   :  { %2417 = vmatpush1.bf16.msra.mxu1 %v2416_v37  ;;  %v1019_v62 = vmax.f32 %v901_v51, 0.0  ;;  %v1035_v63 = vmax.f32 %v981_v52, 0.0  ;;  %v1049_v37 = vld [vmem:[%s4070_s5 + $0x40] sm:$0xff]  ;;  %v1056_v52 = vld [vmem:[%s4070_s5 + $0x78] sm:$0xff] }
 0x209   :  { %v905_v40 = vpop.f32.mrb[22].mxu0  ;;  %v985_v23 = vpop.f32.mrb[22].mxu1  ;;  %2418 = vmatprep.subr.bf16.mxu1 %v2561_v10  ;;  %v1053_v51 = vld [vmem:[%s4070_s5 + $0x60] sm:$0xff] }
 0x20a   :  { %v906_v54 = vadd.f32 %v905_v40, %v3409_v46  ;;  %v986_v55 = vadd.f32 %v985_v23, %v3511_v31  ;;  %v907_v58 = vpop.f32.mrb[23].mxu0  ;;  %v987_v3 = vpop.f32.mrb[23].mxu1  ;;  %v1055_v40 = vld [vmem:[%s4070_s5 + $0x70] sm:$0xff]  ;;  %v1058_v23 = vld [vmem:[%s4070_s5 + $0x88] sm:$0xff] }
 0x20b   :  { %v1059_v58 = vld [vmem:[%s4070_s5 + $0x90] sm:$0xff]  ;;  %v1062_v3 = vld [vmem:[%s4070_s5 + $0xa8] sm:$0xff] }
 0x20c   :  { %v1020_v15 = vmax.f32 %v906_v54, 0.0  ;;  %v1036_v9 = vmax.f32 %v986_v55, 0.0  ;;  %v1057_v54 = vld [vmem:[%s4070_s5 + $0x80] sm:$0xff]  ;;  %v1060_v55 = vld [vmem:[%s4070_s5 + $0x98] sm:$0xff] }
 0x20d   :  { %v910_v2 = vpop.f32.mrb[24].mxu0  ;;  %v990_v6 = vpop.f32.mrb[24].mxu1 }
 0x20e   :  { %v2419_v43 = vpack.c.bf16 %v1020_v15, %v1019_v62  ;;  %v2443_v8 = vpack.c.bf16 %v1036_v9, %v1035_v63  ;;  %v912_v26 = vpop.f32.mrb[25].mxu0  ;;  %v992_v20 = vpop.f32.mrb[25].mxu1  ;;  %v911_v11 = vadd.f32 %v910_v2, %v3417_v49  ;;  %v991_v12 = vadd.f32 %v990_v6, %v3519_v34  ;;  %v1061_v62 = vld [vmem:[%s4070_s5 + $0xa0] sm:$0xff]  ;;  %v1064_v63 = vld [vmem:[%s4070_s5 + $0xb8] sm:$0xff]  ;;  %v1063_v15 = vld [vmem:[%s4070_s5 + $0xb0] sm:$0xff] }
 0x20f   :  { %v1066_v9 = vld [vmem:[%s4070_s5 + $0xc8] sm:$0xff]  ;;  %v1065_v2 = vld [vmem:[%s4070_s5 + $0xc0] sm:$0xff]  ;;  %v1068_v6 = vld [vmem:[%s4070_s5 + $0xd8] sm:$0xff] }
 0x210   :  { %2420 = vmatpush1.bf16.msra.mxu1 %v2419_v43  ;;  %v1021_v60 = vmax.f32 %v911_v11, 0.0  ;;  %v1037_v61 = vmax.f32 %v991_v12, 0.0  ;;  %v1067_v43 = vld [vmem:[%s4070_s5 + $0xd0] sm:$0xff]  ;;  %v1069_v26 = vld [vmem:[%s4070_s5 + $0xe0] sm:$0xff]  ;;  %v1072_v20 = vld [vmem:[%s4070_s5 + $0xf8] sm:$0xff] }
 0x211   :  { %v915_v46 = vpop.f32.mrb[26].mxu0  ;;  %v995_v16 = vpop.f32.mrb[26].mxu1  ;;  %2421 = vmatprep.subr.bf16.mxu1 %v2561_v10  ;;  %v1071_v11 = vld [vmem:[%s4070_s5 + $0xf0] sm:$0xff]  ;;  %v1074_v12 = vld [vmem:[%s4070_s5 + $0x108] sm:$0xff] }
 0x212   :  { %v916_v31 = vadd.f32 %v915_v46, %v3419_v50  ;;  %v996_v56 = vadd.f32 %v995_v16, %v3521_v35  ;;  %v917_v59 = vpop.f32.mrb[27].mxu0  ;;  %v997_v17 = vpop.f32.mrb[27].mxu1  ;;  %v1073_v46 = vld [vmem:[%s4070_s5 + $0x100] sm:$0xff]  ;;  %v1076_v16 = vld [vmem:[%s4070_s5 + $0x118] sm:$0xff] }
 0x213   :  { %v1077_v59 = vld [vmem:[%s4070_s5 + $0x120] sm:$0xff]  ;;  %v1080_v17 = vld [vmem:[%s4070_s5 + $0x138] sm:$0xff] }
 0x214   :  { %v1022_v19 = vmax.f32 %v916_v31, 0.0  ;;  %v1038_v21 = vmax.f32 %v996_v56, 0.0  ;;  %v1075_v31 = vld [vmem:[%s4070_s5 + $0x110] sm:$0xff]  ;;  %v1078_v56 = vld [vmem:[%s4070_s5 + $0x128] sm:$0xff] }
 0x215   :  { %v920_v24 = vpop.f32.mrb[28].mxu0  ;;  %v1000_v27 = vpop.f32.mrb[28].mxu1 }
 0x216   :  { %v2422_v49 = vpack.c.bf16 %v1022_v19, %v1021_v60  ;;  %v2446_v14 = vpack.c.bf16 %v1038_v21, %v1037_v61  ;;  %v922_v34 = vpop.f32.mrb[29].mxu0  ;;  %v1002_v28 = vpop.f32.mrb[29].mxu1  ;;  %v921_v32 = vadd.f32 %v920_v24, %v3427_v53  ;;  %v1001_v30 = vadd.f32 %v1000_v27, %v3523_v38  ;;  %v1041_v53 = vld [vmem:[%s4070_s5] sm:$0xff]  ;;  %v1043_v38 = vld [vmem:[%s4070_s5 + $0x10] sm:$0xff]  ;;  %v1082_v61 = vld [vmem:[%s4070_s5 + $0x148] sm:$0xff] }
 0x217   :  { %v1079_v60 = vld [vmem:[%s4070_s5 + $0x130] sm:$0xff]  ;;  %v1081_v19 = vld [vmem:[%s4070_s5 + $0x140] sm:$0xff]  ;;  %v1084_v21 = vld [vmem:[%s4070_s5 + $0x158] sm:$0xff] }
 0x218   :  { %2423 = vmatpush1.bf16.msra.mxu1 %v2422_v49  ;;  %v1023_v4 = vmax.f32 %v921_v32, 0.0  ;;  %v1039_v0 = vmax.f32 %v1001_v30, 0.0  ;;  %v1083_v24 = vld [vmem:[%s4070_s5 + $0x150] sm:$0xff]  ;;  %v1086_v27 = vld [vmem:[%s4070_s5 + $0x168] sm:$0xff]  ;;  %v1085_v49 = vld [vmem:[%s4070_s5 + $0x160] sm:$0xff] }
 0x219   :  { %v925_v50 = vpop.f32.mrb[30].mxu0  ;;  %v1005_v35 = vpop.f32.mrb[30].mxu1  ;;  %2424 = vmatprep.subr.bf16.mxu1 %v2561_v10  ;;  %v1087_v34 = vld [vmem:[%s4070_s5 + $0x170] sm:$0xff]  ;;  %v1090_v28 = vld [vmem:[%s4070_s5 + $0x188] sm:$0xff]  ;;  %v1092_v32 = vld [vmem:[%s4070_s5 + $0x198] sm:$0xff] }
 0x21a   :  { %v926_v18 = vadd.f32 %v925_v50, %v3435_v57  ;;  %v1006_v33 = vadd.f32 %v1005_v35, %v782_v29  ;;  %v927_v36 = vpop.f32.mrb[31].mxu0  ;;  %v1007_v39 = vpop.f32.mrb[31].mxu1  ;;  %v1044_v57 = vld [vmem:[%s4070_s5 + $0x18] sm:$0xff]  ;;  %v1089_v29 = vld [vmem:[%s4070_s5 + $0x180] sm:$0xff]  ;;  %v1091_v30 = vld [vmem:[%s4070_s5 + $0x190] sm:$0xff] }
 0x21b   :  { %v1094_v50 = vld [vmem:[%s4070_s5 + $0x1a8] sm:$0xff]  ;;  %v1093_v35 = vld [vmem:[%s4070_s5 + $0x1a0] sm:$0xff] }
 0x21c   :  { %v1024_v42 = vmax.f32 %v926_v18, 0.0  ;;  %v1040_v44 = vmax.f32 %v1006_v33, 0.0  ;;  %v1096_v18 = vld [vmem:[%s4070_s5 + $0x1b8] sm:$0xff]  ;;  %v1095_v33 = vld [vmem:[%s4070_s5 + $0x1b0] sm:$0xff]  ;;  %v1098_v36 = vld [vmem:[%s4070_s5 + $0x1c8] sm:$0xff] }
 0x21d   :  { %v1097_v39 = vld [vmem:[%s4070_s5 + $0x1c0] sm:$0xff] }
 0x21e   :  { %v2425_v45 = vpack.c.bf16 %v1024_v42, %v1023_v4  ;;  %v2449_v7 = vpack.c.bf16 %v1040_v44, %v1039_v0  ;;  %v1100_v4 = vld [vmem:[%s4070_s5 + $0x1d8] sm:$0xff]  ;;  %v1099_v0 = vld [vmem:[%s4070_s5 + $0x1d0] sm:$0xff]  ;;  %v1102_v42 = vld [vmem:[%s4070_s5 + $0x1e8] sm:$0xff] }
 0x21f   :  { %v1101_v44 = vld [vmem:[%s4070_s5 + $0x1e0] sm:$0xff] }
 0x220   :  { %2426 = vmatpush1.bf16.msra.mxu1 %v2425_v45  ;;  %v1104_v45 = vld [vmem:[%s4070_s5 + $0x1f8] sm:$0xff] }
 0x221   :  { %2427 = vmatprep.subr.bf16.mxu1 %v2561_v10 }
 0x224   :  { %2429 = vmatpush1.bf16.msra.mxu1 %v3531_v13  ;;  %v1046_v13 = vld [vmem:[%s4070_s5 + $0x28] sm:$0xff] }
 0x225   :  { %2430 = vmatprep.subr.bf16.mxu1 %v2561_v10 }
 0x228   :  { %2432 = vmatpush1.bf16.msra.mxu1 %v3538_v41  ;;  %v1045_v41 = vld [vmem:[%s4070_s5 + $0x20] sm:$0xff] }
 0x229   :  { %2433 = vmatprep.subr.bf16.mxu1 %v2561_v10 }
 0x22c   :  { %2435 = vmatpush1.bf16.msra.mxu1 %v3545_v1  ;;  %v1048_v1 = vld [vmem:[%s4070_s5 + $0x38] sm:$0xff] }
 0x22d   :  { %2436 = vmatprep.subr.bf16.mxu1 %v2561_v10 }
 0x230   :  { %2438 = vmatpush1.bf16.msra.mxu1 %v3552_v25  ;;  %v1047_v25 = vld [vmem:[%s4070_s5 + $0x30] sm:$0xff] }
 0x231   :  { %2439 = vmatprep.subr.bf16.mxu1 %v2561_v10 }
 0x234   :  { %2441 = vmatpush1.bf16.msra.mxu1 %v3559_v47  ;;  %v1052_v47 = vld [vmem:[%s4070_s5 + $0x58] sm:$0xff] }
 0x235   :  { %2442 = vmatprep.subr.bf16.mxu1 %v2561_v10 }
 0x238   :  { %2444 = vmatpush1.bf16.msra.mxu1 %v2443_v8  ;;  %v1070_v8 = vld [vmem:[%s4070_s5 + $0xe8] sm:$0xff] }
 0x239   :  { %2445 = vmatprep.subr.bf16.mxu1 %v2561_v10 }
 0x23c   :  { %2447 = vmatpush1.bf16.msra.mxu1 %v2446_v14  ;;  %v1088_v14 = vld [vmem:[%s4070_s5 + $0x178] sm:$0xff] }
 0x23d   :  { %2448 = vmatprep.subr.bf16.mxu1 %v2561_v10 }
 0x240   :  { %2450 = vmatpush1.bf16.msra.mxu1 %v2449_v7  ;;  %v1103_v7 = vld [vmem:[%s4070_s5 + $0x1f0] sm:$0xff] }
 0x243   :  { %1362 = vmatmul.mubr.f32.vlgmr.msra.gmra.mrb[32].mxu1 %v1041_v53 }
 0x244   :  { %1366 = vmatprep.mubr.f32.mxu1 %v1044_v57 }
 0x247   :  { %1367 = vmatmul.mubr.f32.gmra.mrb[34].mxu1 %v1043_v38  ;;  %v1140_v38 = vpop.permute.xlu0 %1139 }
 0x248   :  { %1371 = vmatprep.mubr.f32.mxu1 %v1046_v13 }
 0x24b   :  { %1372 = vmatmul.mubr.f32.gmra.mrb[36].mxu1 %v1045_v41  ;;  %v1555_v41 = vld [vmem:[%s4072_s7 + $0x8] sm:$0xff] }
 0x24c   :  { %1376 = vmatprep.mubr.f32.mxu1 %v1048_v1  ;;  %v1145_v1 = vpop.permute.xlu1 %1144  ;;  %1874 = vmatprep.mubr.f32.mxu0 %v1555_v41 }
 0x24f   :  { %1377 = vmatmul.mubr.f32.gmra.mrb[38].mxu1 %v1047_v25 }
 0x250   :  { %1381 = vmatprep.mubr.f32.mxu1 %v1050_v5 }
 0x253   :  { %1382 = vmatmul.mubr.f32.gmra.mrb[40].mxu1 %v1049_v37 }
 0x254   :  { %1386 = vmatprep.mubr.f32.mxu1 %v1052_v47 }
 0x257   :  { %1387 = vmatmul.mubr.f32.gmra.mrb[42].mxu1 %v1051_v22 }
 0x258   :  { %1391 = vmatprep.mubr.f32.mxu1 %v1054_v48 }
 0x25b   :  { %1392 = vmatmul.mubr.f32.gmra.mrb[44].mxu1 %v1053_v51 }
 0x25c   :  { %1396 = vmatprep.mubr.f32.mxu1 %v1056_v52 }
 0x25f   :  { %1397 = vmatmul.mubr.f32.gmra.mrb[46].mxu1 %v1055_v40  ;;  %v1150_v40 = vpop.permute.xlu0 %1149 }
 0x260   :  { %1401 = vmatprep.mubr.f32.mxu1 %v1058_v23 }
 0x263   :  { %1402 = vmatmul.mubr.f32.gmra.mrb[48].mxu1 %v1057_v54  ;;  %v1155_v54 = vpop.permute.xlu1 %1154 }
 0x264   :  { %1406 = vmatprep.mubr.f32.mxu1 %v1060_v55 }
 0x267   :  { %1407 = vmatmul.mubr.f32.gmra.mrb[50].mxu1 %v1059_v58 }
 0x268   :  { %1411 = vmatprep.mubr.f32.mxu1 %v1062_v3 }
 0x26b   :  { %1412 = vmatmul.mubr.f32.gmra.mrb[52].mxu1 %v1061_v62 }
 0x26c   :  { %1416 = vmatprep.mubr.f32.mxu1 %v1064_v63 }
 0x26f   :  { %1417 = vmatmul.mubr.f32.gmra.mrb[54].mxu1 %v1063_v15 }
 0x270   :  { %1421 = vmatprep.mubr.f32.mxu1 %v1066_v9 }
 0x273   :  { %1422 = vmatmul.mubr.f32.gmra.mrb[56].mxu1 %v1065_v2 }
 0x274   :  { %1426 = vmatprep.mubr.f32.mxu1 %v1068_v6  ;;  %v1160_v6 = vpop.permute.xlu0 %1159 }
 0x277   :  { %1427 = vmatmul.mubr.f32.gmra.mrb[58].mxu1 %v1067_v43 }
 0x278   :  { %1431 = vmatprep.mubr.f32.mxu1 %v1070_v8  ;;  %v1165_v8 = vpop.permute.xlu1 %1164 }
 0x27b   :  { %1432 = vmatmul.mubr.f32.gmra.mrb[60].mxu1 %v1069_v26 }
 0x27c   :  { %1436 = vmatprep.mubr.f32.mxu1 %v1072_v20 }
 0x27f   :  { %1437 = vmatmul.mubr.f32.gmra.mrb[62].mxu1 %v1071_v11 }
 0x280   :  { %1441 = vmatprep.mubr.f32.mxu1 %v1074_v12 }
 0x283   :  { %1442 = vmatmul.mubr.f32.gmra.mrb[64].mxu1 %v1073_v46 }
 0x284   :  { %1446 = vmatprep.mubr.f32.mxu1 %v1076_v16 }
 0x287   :  { %1447 = vmatmul.mubr.f32.gmra.mrb[66].mxu1 %v1075_v31 }
 0x288   :  { %1451 = vmatprep.mubr.f32.mxu1 %v1078_v56 }
 0x28b   :  { %1452 = vmatmul.mubr.f32.gmra.mrb[68].mxu1 %v1077_v59  ;;  %v1170_v59 = vpop.permute.xlu0 %1169 }
 0x28c   :  { %1456 = vmatprep.mubr.f32.mxu1 %v1080_v17 }
 0x28f   :  { %1457 = vmatmul.mubr.f32.gmra.mrb[70].mxu1 %v1079_v60  ;;  %v1175_v60 = vpop.permute.xlu1 %1174 }
 0x290   :  { %1461 = vmatprep.mubr.f32.mxu1 %v1082_v61 }
 0x293   :  { %1462 = vmatmul.mubr.f32.gmra.mrb[72].mxu1 %v1081_v19 }
 0x294   :  { %1466 = vmatprep.mubr.f32.mxu1 %v1084_v21 }
 0x297   :  { %1467 = vmatmul.mubr.f32.gmra.mrb[74].mxu1 %v1083_v24 }
 0x298   :  { %1471 = vmatprep.mubr.f32.mxu1 %v1086_v27 }
 0x29b   :  { %1472 = vmatmul.mubr.f32.gmra.mrb[76].mxu1 %v1085_v49 }
 0x29c   :  { %1476 = vmatprep.mubr.f32.mxu1 %v1088_v14 }
 0x29f   :  { %1477 = vmatmul.mubr.f32.gmra.mrb[78].mxu1 %v1087_v34 }
 0x2a0   :  { %1481 = vmatprep.mubr.f32.mxu1 %v1090_v28  ;;  %v1180_v28 = vpop.permute.xlu0 %1179 }
 0x2a3   :  { %1482 = vmatmul.mubr.f32.gmra.mrb[80].mxu1 %v1089_v29 }
 0x2a4   :  { %1486 = vmatprep.mubr.f32.mxu1 %v1092_v32  ;;  %v1185_v32 = vpop.permute.xlu1 %1184 }
 0x2a7   :  { %1487 = vmatmul.mubr.f32.gmra.mrb[82].mxu1 %v1091_v30 }
 0x2a8   :  { %1491 = vmatprep.mubr.f32.mxu1 %v1094_v50 }
 0x2ab   :  { %1492 = vmatmul.mubr.f32.gmra.mrb[84].mxu1 %v1093_v35 }
 0x2ac   :  { %1496 = vmatprep.mubr.f32.mxu1 %v1096_v18 }
 0x2af   :  { %1497 = vmatmul.mubr.f32.gmra.mrb[86].mxu1 %v1095_v33 }
 0x2b0   :  { %1501 = vmatprep.mubr.f32.mxu1 %v1098_v36 }
 0x2b3   :  { %1502 = vmatmul.mubr.f32.gmra.mrb[88].mxu1 %v1097_v39 }
 0x2b4   :  { %1506 = vmatprep.mubr.f32.mxu1 %v1100_v4 }
 0x2b7   :  { %1507 = vmatmul.mubr.f32.gmra.mrb[90].mxu1 %v1099_v0  ;;  %v1190_v0 = vpop.permute.xlu0 %1189 }
 0x2b8   :  { %1511 = vmatprep.mubr.f32.mxu1 %v1102_v42 }
 0x2bb   :  { %1512 = vmatmul.mubr.f32.gmra.mrb[92].mxu1 %v1101_v44  ;;  %v1195_v44 = vpop.permute.xlu1 %1194 }
 0x2bc   :  { %1516 = vmatprep.mubr.f32.mxu1 %v1104_v45 }
 0x2bf   :  { %1517 = vmatmul.mubr.f32.gmra.mrb[94].mxu1 %v1103_v7 }
 0x316   :  { %v1363_v53 = vpop.f32.mrb[32].mxu1 }
 0x317   :  { %v1365_v57 = vpop.f32.mrb[33].mxu1  ;;  %v1364_v13 = vadd.f32 %v1363_v53, %v1140_v38 }
 0x319   :  { %v1522_v47 = vmax.f32 %v1364_v13, 0.0 }
 0x31a   :  { %v1368_v25 = vpop.f32.mrb[34].mxu1 }
 0x31b   :  { %v1369_v5 = vadd.f32 %v1368_v25, %v1145_v1  ;;  %v1370_v37 = vpop.f32.mrb[35].mxu1  ;;  %v1200_v25 = vpop.permute.xlu0 %1199 }
 0x31c   :  { %v1205_v37 = vpop.permute.xlu1 %1204 }
 0x31d   :  { %v1523_v22 = vmax.f32 %v1369_v5, 0.0 }
 0x31e   :  { %v1373_v48 = vpop.f32.mrb[36].mxu1 }
 0x31f   :  { %v2452_v51 = vpack.c.bf16 %v1523_v22, %v1522_v47  ;;  %v1375_v52 = vpop.f32.mrb[37].mxu1  ;;  %v1374_v23 = vadd.f32 %v1373_v48, %v1150_v40 }
 0x321   :  { %2453 = vmatpush1.bf16.msra.mxu0 %v2452_v51  ;;  %v1524_v62 = vmax.f32 %v1374_v23, 0.0 }
 0x322   :  { %v1378_v55 = vpop.f32.mrb[38].mxu1  ;;  %2454 = vmatprep.subr.bf16.mxu0 %v2561_v10 }
 0x323   :  { %v1379_v58 = vadd.f32 %v1378_v55, %v1155_v54  ;;  %v1380_v3 = vpop.f32.mrb[39].mxu1  ;;  %v1210_v55 = vpop.permute.xlu0 %1209 }
 0x324   :  { %v1215_v3 = vpop.permute.xlu1 %1214 }
 0x325   :  { %v1525_v63 = vmax.f32 %v1379_v58, 0.0 }
 0x326   :  { %v1383_v15 = vpop.f32.mrb[40].mxu1 }
 0x327   :  { %v2455_v9 = vpack.c.bf16 %v1525_v63, %v1524_v62  ;;  %v1385_v2 = vpop.f32.mrb[41].mxu1  ;;  %v1384_v43 = vadd.f32 %v1383_v15, %v1160_v6 }
 0x329   :  { %2456 = vmatpush1.bf16.msra.mxu0 %v2455_v9  ;;  %v1526_v12 = vmax.f32 %v1384_v43, 0.0 }
 0x32a   :  { %v1388_v26 = vpop.f32.mrb[42].mxu1  ;;  %2457 = vmatprep.subr.bf16.mxu0 %v2561_v10 }
 0x32b   :  { %v1389_v20 = vadd.f32 %v1388_v26, %v1165_v8  ;;  %v1390_v11 = vpop.f32.mrb[43].mxu1  ;;  %v1220_v26 = vpop.permute.xlu0 %1219 }
 0x32c   :  { %v1225_v11 = vpop.permute.xlu1 %1224 }
 0x32d   :  { %v1527_v46 = vmax.f32 %v1389_v20, 0.0 }
 0x32e   :  { %v1393_v16 = vpop.f32.mrb[44].mxu1 }
 0x32f   :  { %v2458_v31 = vpack.c.bf16 %v1527_v46, %v1526_v12  ;;  %v1395_v56 = vpop.f32.mrb[45].mxu1  ;;  %v1394_v17 = vadd.f32 %v1393_v16, %v1170_v59 }
 0x331   :  { %2459 = vmatpush1.bf16.msra.mxu0 %v2458_v31  ;;  %v1528_v24 = vmax.f32 %v1394_v17, 0.0 }
 0x332   :  { %v1398_v61 = vpop.f32.mrb[46].mxu1  ;;  %2460 = vmatprep.subr.bf16.mxu0 %v2561_v10 }
 0x333   :  { %v1399_v19 = vadd.f32 %v1398_v61, %v1175_v60  ;;  %v1400_v21 = vpop.f32.mrb[47].mxu1  ;;  %v1230_v61 = vpop.permute.xlu0 %1229 }
 0x334   :  { %v1235_v21 = vpop.permute.xlu1 %1234 }
 0x335   :  { %v1529_v27 = vmax.f32 %v1399_v19, 0.0 }
 0x336   :  { %v1403_v49 = vpop.f32.mrb[48].mxu1 }
 0x337   :  { %v2461_v14 = vpack.c.bf16 %v1529_v27, %v1528_v24  ;;  %v1405_v34 = vpop.f32.mrb[49].mxu1  ;;  %v1404_v29 = vadd.f32 %v1403_v49, %v1180_v28 }
 0x339   :  { %2462 = vmatpush1.bf16.msra.mxu0 %v2461_v14  ;;  %v1530_v18 = vmax.f32 %v1404_v29, 0.0 }
 0x33a   :  { %v1408_v30 = vpop.f32.mrb[50].mxu1  ;;  %2463 = vmatprep.subr.bf16.mxu0 %v2561_v10 }
 0x33b   :  { %v1409_v50 = vadd.f32 %v1408_v30, %v1185_v32  ;;  %v1410_v35 = vpop.f32.mrb[51].mxu1  ;;  %v1240_v30 = vpop.permute.xlu0 %1239 }
 0x33c   :  { %v1245_v35 = vpop.permute.xlu1 %1244 }
 0x33d   :  { %v1531_v33 = vmax.f32 %v1409_v50, 0.0 }
 0x33e   :  { %v1413_v36 = vpop.f32.mrb[52].mxu1 }
 0x33f   :  { %v2464_v39 = vpack.c.bf16 %v1531_v33, %v1530_v18  ;;  %v1415_v4 = vpop.f32.mrb[53].mxu1  ;;  %v1414_v42 = vadd.f32 %v1413_v36, %v1190_v0 }
 0x341   :  { %2465 = vmatpush1.bf16.msra.mxu0 %v2464_v39  ;;  %v1532_v57 = vmax.f32 %v1414_v42, 0.0 }
 0x342   :  { %v1418_v45 = vpop.f32.mrb[54].mxu1  ;;  %2466 = vmatprep.subr.bf16.mxu0 %v2561_v10 }
 0x343   :  { %v1419_v7 = vadd.f32 %v1418_v45, %v1195_v44  ;;  %v1420_v53 = vpop.f32.mrb[55].mxu1  ;;  %v1250_v45 = vpop.permute.xlu0 %1249 }
 0x344   :  { %v1255_v53 = vpop.permute.xlu1 %1254 }
 0x345   :  { %v1533_v38 = vmax.f32 %v1419_v7, 0.0 }
 0x346   :  { %v1423_v13 = vpop.f32.mrb[56].mxu1 }
 0x347   :  { %v2467_v41 = vpack.c.bf16 %v1533_v38, %v1532_v57  ;;  %v1425_v1 = vpop.f32.mrb[57].mxu1  ;;  %v1424_v5 = vadd.f32 %v1423_v13, %v1200_v25 }
 0x349   :  { %2468 = vmatpush1.bf16.msra.mxu0 %v2467_v41  ;;  %v1534_v51 = vmax.f32 %v1424_v5, 0.0 }
 0x34a   :  { %v1428_v47 = vpop.f32.mrb[58].mxu1  ;;  %2469 = vmatprep.subr.bf16.mxu0 %v2561_v10 }
 0x34b   :  { %v1429_v22 = vadd.f32 %v1428_v47, %v1205_v37  ;;  %v1430_v48 = vpop.f32.mrb[59].mxu1  ;;  %v1260_v47 = vpop.permute.xlu0 %1259 }
 0x34c   :  { %v1265_v48 = vpop.permute.xlu1 %1264 }
 0x34d   :  { %v1535_v52 = vmax.f32 %v1429_v22, 0.0 }
 0x34e   :  { %v1433_v40 = vpop.f32.mrb[60].mxu1 }
 0x34f   :  { %v2470_v23 = vpack.c.bf16 %v1535_v52, %v1534_v51  ;;  %v1435_v54 = vpop.f32.mrb[61].mxu1  ;;  %v1434_v58 = vadd.f32 %v1433_v40, %v1210_v55 }
 0x351   :  { %2471 = vmatpush1.bf16.msra.mxu0 %v2470_v23  ;;  %v1536_v9 = vmax.f32 %v1434_v58, 0.0 }
 0x352   :  { %v1438_v62 = vpop.f32.mrb[62].mxu1  ;;  %2472 = vmatprep.subr.bf16.mxu0 %v2561_v10 }
 0x353   :  { %v1439_v63 = vadd.f32 %v1438_v62, %v1215_v3  ;;  %v1440_v15 = vpop.f32.mrb[63].mxu1  ;;  %v1270_v62 = vpop.permute.xlu0 %1269 }
 0x354   :  { %v1275_v15 = vpop.permute.xlu1 %1274 }
 0x355   :  { %v1537_v2 = vmax.f32 %v1439_v63, 0.0 }
 0x356   :  { %v1443_v6 = vpop.f32.mrb[64].mxu1 }
 0x357   :  { %v2473_v43 = vpack.c.bf16 %v1537_v2, %v1536_v9  ;;  %v1445_v8 = vpop.f32.mrb[65].mxu1  ;;  %v1444_v20 = vadd.f32 %v1443_v6, %v1220_v26 }
 0x359   :  { %2474 = vmatpush1.bf16.msra.mxu0 %v2473_v43  ;;  %v1538_v31 = vmax.f32 %v1444_v20, 0.0 }
 0x35a   :  { %v1448_v12 = vpop.f32.mrb[66].mxu1  ;;  %2475 = vmatprep.subr.bf16.mxu0 %v2561_v10 }
 0x35b   :  { %v1449_v46 = vadd.f32 %v1448_v12, %v1225_v11  ;;  %v1450_v16 = vpop.f32.mrb[67].mxu1  ;;  %v1280_v12 = vpop.permute.xlu0 %1279 }
 0x35c   :  { %v1285_v16 = vpop.permute.xlu1 %1284 }
 0x35d   :  { %v1539_v56 = vmax.f32 %v1449_v46, 0.0 }
 0x35e   :  { %v1453_v59 = vpop.f32.mrb[68].mxu1 }
 0x35f   :  { %v2476_v17 = vpack.c.bf16 %v1539_v56, %v1538_v31  ;;  %v1455_v60 = vpop.f32.mrb[69].mxu1  ;;  %v1454_v19 = vadd.f32 %v1453_v59, %v1230_v61 }
 0x361   :  { %2477 = vmatpush1.bf16.msra.mxu0 %v2476_v17  ;;  %v1540_v14 = vmax.f32 %v1454_v19, 0.0 }
 0x362   :  { %v1458_v24 = vpop.f32.mrb[70].mxu1  ;;  %2478 = vmatprep.subr.bf16.mxu0 %v2561_v10 }
 0x363   :  { %v1459_v27 = vadd.f32 %v1458_v24, %v1235_v21  ;;  %v1460_v49 = vpop.f32.mrb[71].mxu1  ;;  %v1290_v24 = vpop.permute.xlu0 %1289 }
 0x364   :  { %v1295_v49 = vpop.permute.xlu1 %1294 }
 0x365   :  { %v1541_v34 = vmax.f32 %v1459_v27, 0.0 }
 0x366   :  { %v1463_v28 = vpop.f32.mrb[72].mxu1 }
 0x367   :  { %v2479_v29 = vpack.c.bf16 %v1541_v34, %v1540_v14  ;;  %v1465_v32 = vpop.f32.mrb[73].mxu1  ;;  %v1464_v50 = vadd.f32 %v1463_v28, %v1240_v30 }
 0x369   :  { %2480 = vmatpush1.bf16.msra.mxu0 %v2479_v29  ;;  %v1542_v39 = vmax.f32 %v1464_v50, 0.0  ;;  %v1554_v50 = vld [vmem:[%s4072_s7] sm:$0xff] }
 0x36a   :  { %v1468_v18 = vpop.f32.mrb[74].mxu1  ;;  %2481 = vmatprep.subr.bf16.mxu0 %v2561_v10 }
 0x36b   :  { %v1469_v33 = vadd.f32 %v1468_v18, %v1245_v35  ;;  %v1470_v36 = vpop.f32.mrb[75].mxu1  ;;  %v1557_v35 = vld [vmem:[%s4072_s7 + $0x18] sm:$0xff]  ;;  %v1559_v18 = vld [vmem:[%s4072_s7 + $0x28] sm:$0xff] }
 0x36c   :  { %v1561_v36 = vld [vmem:[%s4072_s7 + $0x38] sm:$0xff] }
 0x36d   :  { %v1543_v4 = vmax.f32 %v1469_v33, 0.0  ;;  %v1558_v33 = vld [vmem:[%s4072_s7 + $0x20] sm:$0xff] }
 0x36e   :  { %v1473_v0 = vpop.f32.mrb[76].mxu1 }
 0x36f   :  { %v2482_v42 = vpack.c.bf16 %v1543_v4, %v1542_v39  ;;  %v1475_v44 = vpop.f32.mrb[77].mxu1  ;;  %v1474_v7 = vadd.f32 %v1473_v0, %v1250_v45  ;;  %v1560_v39 = vld [vmem:[%s4072_s7 + $0x30] sm:$0xff]  ;;  %v1563_v4 = vld [vmem:[%s4072_s7 + $0x48] sm:$0xff]  ;;  %v1562_v0 = vld [vmem:[%s4072_s7 + $0x40] sm:$0xff] }
 0x370   :  { %v1564_v44 = vld [vmem:[%s4072_s7 + $0x50] sm:$0xff]  ;;  %v1567_v45 = vld [vmem:[%s4072_s7 + $0x68] sm:$0xff] }
 0x371   :  { %2483 = vmatpush1.bf16.msra.mxu0 %v2482_v42  ;;  %v1544_v41 = vmax.f32 %v1474_v7, 0.0  ;;  %v1565_v42 = vld [vmem:[%s4072_s7 + $0x58] sm:$0xff]  ;;  %v1566_v7 = vld [vmem:[%s4072_s7 + $0x60] sm:$0xff] }
 0x372   :  { %v1478_v57 = vpop.f32.mrb[78].mxu1  ;;  %2484 = vmatprep.subr.bf16.mxu0 %v2561_v10 }
 0x373   :  { %v1479_v38 = vadd.f32 %v1478_v57, %v1255_v53  ;;  %v1480_v13 = vpop.f32.mrb[79].mxu1  ;;  %v1569_v53 = vld [vmem:[%s4072_s7 + $0x78] sm:$0xff]  ;;  %v1568_v57 = vld [vmem:[%s4072_s7 + $0x70] sm:$0xff] }
 0x374   :  { %v1570_v13 = vld [vmem:[%s4072_s7 + $0x80] sm:$0xff] }
 0x375   :  { %v1545_v1 = vmax.f32 %v1479_v38, 0.0  ;;  %v1571_v38 = vld [vmem:[%s4072_s7 + $0x88] sm:$0xff] }
 0x376   :  { %v1483_v25 = vpop.f32.mrb[80].mxu1 }
 0x377   :  { %v2485_v5 = vpack.c.bf16 %v1545_v1, %v1544_v41  ;;  %v1485_v37 = vpop.f32.mrb[81].mxu1  ;;  %v1484_v22 = vadd.f32 %v1483_v25, %v1260_v47  ;;  %v1573_v41 = vld [vmem:[%s4072_s7 + $0x98] sm:$0xff]  ;;  %v1572_v1 = vld [vmem:[%s4072_s7 + $0x90] sm:$0xff]  ;;  %v1575_v25 = vld [vmem:[%s4072_s7 + $0xa8] sm:$0xff] }
 0x378   :  { %v1577_v37 = vld [vmem:[%s4072_s7 + $0xb8] sm:$0xff]  ;;  %v1576_v47 = vld [vmem:[%s4072_s7 + $0xb0] sm:$0xff] }
 0x379   :  { %2486 = vmatpush1.bf16.msra.mxu0 %v2485_v5  ;;  %v1546_v23 = vmax.f32 %v1484_v22, 0.0  ;;  %v1574_v5 = vld [vmem:[%s4072_s7 + $0xa0] sm:$0xff]  ;;  %v1579_v22 = vld [vmem:[%s4072_s7 + $0xc8] sm:$0xff] }
 0x37a   :  { %v1488_v51 = vpop.f32.mrb[82].mxu1  ;;  %2487 = vmatprep.subr.bf16.mxu0 %v2561_v10 }
 0x37b   :  { %v1489_v52 = vadd.f32 %v1488_v51, %v1265_v48  ;;  %v1490_v40 = vpop.f32.mrb[83].mxu1  ;;  %v1578_v48 = vld [vmem:[%s4072_s7 + $0xc0] sm:$0xff]  ;;  %v1581_v51 = vld [vmem:[%s4072_s7 + $0xd8] sm:$0xff] }
 0x37c   :  { %v1583_v40 = vld [vmem:[%s4072_s7 + $0xe8] sm:$0xff] }
 0x37d   :  { %v1547_v54 = vmax.f32 %v1489_v52, 0.0  ;;  %v1580_v52 = vld [vmem:[%s4072_s7 + $0xd0] sm:$0xff] }
 0x37e   :  { %v1493_v55 = vpop.f32.mrb[84].mxu1 }
 0x37f   :  { %v2488_v58 = vpack.c.bf16 %v1547_v54, %v1546_v23  ;;  %v1495_v3 = vpop.f32.mrb[85].mxu1  ;;  %v1494_v63 = vadd.f32 %v1493_v55, %v1270_v62  ;;  %v1582_v23 = vld [vmem:[%s4072_s7 + $0xe0] sm:$0xff]  ;;  %v1585_v54 = vld [vmem:[%s4072_s7 + $0xf8] sm:$0xff]  ;;  %v1584_v55 = vld [vmem:[%s4072_s7 + $0xf0] sm:$0xff] }
 0x380   :  { %v1586_v3 = vld [vmem:[%s4072_s7 + $0x100] sm:$0xff]  ;;  %v1589_v62 = vld [vmem:[%s4072_s7 + $0x118] sm:$0xff] }
 0x381   :  { %2489 = vmatpush1.bf16.msra.mxu0 %v2488_v58  ;;  %v1548_v43 = vmax.f32 %v1494_v63, 0.0  ;;  %v1587_v58 = vld [vmem:[%s4072_s7 + $0x108] sm:$0xff]  ;;  %v1588_v63 = vld [vmem:[%s4072_s7 + $0x110] sm:$0xff] }
 0x382   :  { %v1498_v9 = vpop.f32.mrb[86].mxu1  ;;  %2490 = vmatprep.subr.bf16.mxu0 %v2561_v10 }
 0x383   :  { %v1499_v2 = vadd.f32 %v1498_v9, %v1275_v15  ;;  %v1500_v6 = vpop.f32.mrb[87].mxu1  ;;  %v1591_v15 = vld [vmem:[%s4072_s7 + $0x128] sm:$0xff]  ;;  %v1590_v9 = vld [vmem:[%s4072_s7 + $0x120] sm:$0xff] }
 0x384   :  { %v1592_v6 = vld [vmem:[%s4072_s7 + $0x130] sm:$0xff] }
 0x385   :  { %v1549_v8 = vmax.f32 %v1499_v2, 0.0  ;;  %v1593_v2 = vld [vmem:[%s4072_s7 + $0x138] sm:$0xff] }
 0x386   :  { %v1503_v26 = vpop.f32.mrb[88].mxu1 }
 0x387   :  { %v2491_v20 = vpack.c.bf16 %v1549_v8, %v1548_v43  ;;  %v1505_v11 = vpop.f32.mrb[89].mxu1  ;;  %v1504_v46 = vadd.f32 %v1503_v26, %v1280_v12  ;;  %v1595_v43 = vld [vmem:[%s4072_s7 + $0x148] sm:$0xff]  ;;  %v1594_v8 = vld [vmem:[%s4072_s7 + $0x140] sm:$0xff]  ;;  %v1597_v26 = vld [vmem:[%s4072_s7 + $0x158] sm:$0xff] }
 0x388   :  { %v1599_v11 = vld [vmem:[%s4072_s7 + $0x168] sm:$0xff]  ;;  %v1598_v12 = vld [vmem:[%s4072_s7 + $0x160] sm:$0xff] }
 0x389   :  { %2492 = vmatpush1.bf16.msra.mxu0 %v2491_v20  ;;  %v1550_v17 = vmax.f32 %v1504_v46, 0.0  ;;  %v1596_v20 = vld [vmem:[%s4072_s7 + $0x150] sm:$0xff]  ;;  %v1601_v46 = vld [vmem:[%s4072_s7 + $0x178] sm:$0xff] }
 0x38a   :  { %v1508_v31 = vpop.f32.mrb[90].mxu1  ;;  %2493 = vmatprep.subr.bf16.mxu0 %v2561_v10 }
 0x38b   :  { %v1509_v56 = vadd.f32 %v1508_v31, %v1285_v16  ;;  %v1510_v59 = vpop.f32.mrb[91].mxu1  ;;  %v1600_v16 = vld [vmem:[%s4072_s7 + $0x170] sm:$0xff]  ;;  %v1603_v31 = vld [vmem:[%s4072_s7 + $0x188] sm:$0xff] }
 0x38c   :  { %v1605_v59 = vld [vmem:[%s4072_s7 + $0x198] sm:$0xff] }
 0x38d   :  { %v1551_v60 = vmax.f32 %v1509_v56, 0.0  ;;  %v1602_v56 = vld [vmem:[%s4072_s7 + $0x180] sm:$0xff] }
 0x38e   :  { %v1513_v61 = vpop.f32.mrb[92].mxu1 }
 0x38f   :  { %v2494_v19 = vpack.c.bf16 %v1551_v60, %v1550_v17  ;;  %v1515_v21 = vpop.f32.mrb[93].mxu1  ;;  %v1514_v27 = vadd.f32 %v1513_v61, %v1290_v24  ;;  %v1604_v17 = vld [vmem:[%s4072_s7 + $0x190] sm:$0xff]  ;;  %v1607_v60 = vld [vmem:[%s4072_s7 + $0x1a8] sm:$0xff]  ;;  %v1606_v61 = vld [vmem:[%s4072_s7 + $0x1a0] sm:$0xff] }
 0x390   :  { %v1608_v21 = vld [vmem:[%s4072_s7 + $0x1b0] sm:$0xff]  ;;  %v1611_v24 = vld [vmem:[%s4072_s7 + $0x1c8] sm:$0xff] }
 0x391   :  { %2495 = vmatpush1.bf16.msra.mxu0 %v2494_v19  ;;  %v1552_v29 = vmax.f32 %v1514_v27, 0.0  ;;  %v1609_v19 = vld [vmem:[%s4072_s7 + $0x1b8] sm:$0xff]  ;;  %v1610_v27 = vld [vmem:[%s4072_s7 + $0x1c0] sm:$0xff] }
 0x392   :  { %v1518_v14 = vpop.f32.mrb[94].mxu1  ;;  %2496 = vmatprep.subr.bf16.mxu0 %v2561_v10  ;;  %v1556_v10 = vld [vmem:[%s4072_s7 + $0x10] sm:$0xff] }
 0x393   :  { %v1519_v34 = vadd.f32 %v1518_v14, %v1295_v49  ;;  %v1520_v28 = vpop.f32.mrb[95].mxu1  ;;  %v1613_v49 = vld [vmem:[%s4072_s7 + $0x1d8] sm:$0xff]  ;;  %v1612_v14 = vld [vmem:[%s4072_s7 + $0x1d0] sm:$0xff] }
 0x394   :  { %v1614_v28 = vld [vmem:[%s4072_s7 + $0x1e0] sm:$0xff] }
 0x395   :  { %v1553_v32 = vmax.f32 %v1519_v34, 0.0  ;;  %v1615_v34 = vld [vmem:[%s4072_s7 + $0x1e8] sm:$0xff] }
 0x397   :  { %v2497_v30 = vpack.c.bf16 %v1553_v32, %v1552_v29  ;;  %v1617_v29 = vld [vmem:[%s4072_s7 + $0x1f8] sm:$0xff]  ;;  %v1616_v32 = vld [vmem:[%s4072_s7 + $0x1f0] sm:$0xff]  ;;  %s2562_s7 = smov [#allocation3]  }
 0x398   :  { %s2346_s18 = sshll.u32 %s2562_s7, 4  ;;  %s2347_s18 = int_to_ptr.vmem [resolvable:$true] %s2346_s18 }
 0x399   :  { %2498 = vmatpush1.bf16.msra.mxu0 %v2497_v30  ;;  %v1653_v30 = vpop.permute.xlu0 %1652  ;;  %s2536_s8 = scalar_lea.vmem %s2347_s18, 16  ;;  %s2540_s19 = scalar_lea.vmem %s2347_s18, 32 }
 0x39a   :  { %p2537_p0 = scmp.ne.s32.totalorder %s2347_s18, %s2536_s8  ;;  %p2541_p1 = scmp.lt.s32.totalorder %s2347_s18, %s2347_s18 }
 0x39b   :  { %p2542_p2 = scmp.lt.s32.totalorder %s2540_s19, %s2536_s8 }
 0x39c   :  { %1875 = vmatmul.mubr.f32.vlgmr.msra.gmra.mrb[32].mxu0 %v1554_v50  ;;  %v1658_v50 = vpop.permute.xlu1 %1657 }
 0x39d   :  { %1879 = vmatprep.mubr.f32.mxu0 %v1557_v35  ;;  %v1663_v35 = vpop.permute.xlu0 %1662  ;;  %p2543_p3 = por %p2542_p2, %p2541_p1 }
 0x39f   :  { %p2544_p4 = pnand %p2543_p3, %p2537_p0 }
 0x3a0   :  { %1880 = vmatmul.mubr.f32.gmra.mrb[34].mxu0 %v1556_v10  ;;  %v1668_v10 = vpop.permute.xlu1 %1667 }
 0x3a1   :  { %1884 = vmatprep.mubr.f32.mxu0 %v1559_v18  ;;  %v1673_v18 = vpop.permute.xlu0 %1672 }
 0x3a4   :  { %1885 = vmatmul.mubr.f32.gmra.mrb[36].mxu0 %v1558_v33  ;;  %v1678_v33 = vpop.permute.xlu1 %1677 }
 0x3a5   :  { %1889 = vmatprep.mubr.f32.mxu0 %v1561_v36  ;;  %v3984_v36 = vpop.permute.xlu0 %1682 }
 0x3a8   :  { %1890 = vmatmul.mubr.f32.gmra.mrb[38].mxu0 %v1560_v39  ;;  %v3986_v39 = vpop.permute.xlu1 %1687 }
 0x3a9   :  { %1894 = vmatprep.mubr.f32.mxu0 %v1563_v4  ;;  %v3988_v4 = vpop.permute.xlu0 %1692 }
 0x3ac   :  { %1895 = vmatmul.mubr.f32.gmra.mrb[40].mxu0 %v1562_v0  ;;  %v3990_v0 = vpop.permute.xlu1 %1697 }
 0x3ad   :  { %1899 = vmatprep.mubr.f32.mxu0 %v1565_v42  ;;  %v3992_v42 = vpop.permute.xlu0 %1702 }
 0x3b0   :  { %1900 = vmatmul.mubr.f32.gmra.mrb[42].mxu0 %v1564_v44  ;;  %v3994_v44 = vpop.permute.xlu1 %1707 }
 0x3b1   :  { %1904 = vmatprep.mubr.f32.mxu0 %v1567_v45  ;;  %v3996_v45 = vpop.permute.xlu0 %1712 }
 0x3b4   :  { %1905 = vmatmul.mubr.f32.gmra.mrb[44].mxu0 %v1566_v7  ;;  %v3998_v7 = vpop.permute.xlu1 %1717 }
 0x3b5   :  { %1909 = vmatprep.mubr.f32.mxu0 %v1569_v53  ;;  %v4000_v53 = vpop.permute.xlu0 %1722 }
 0x3b8   :  { %1910 = vmatmul.mubr.f32.gmra.mrb[46].mxu0 %v1568_v57  ;;  %v4002_v57 = vpop.permute.xlu1 %1727 }
 0x3b9   :  { %1914 = vmatprep.mubr.f32.mxu0 %v1571_v38  ;;  %v4004_v38 = vpop.permute.xlu0 %1732 }
 0x3bc   :  { %1915 = vmatmul.mubr.f32.gmra.mrb[48].mxu0 %v1570_v13  ;;  %v4006_v13 = vpop.permute.xlu1 %1737 }
 0x3bd   :  { %1919 = vmatprep.mubr.f32.mxu0 %v1573_v41  ;;  %v4008_v41 = vpop.permute.xlu0 %1742 }
 0x3c0   :  { %1920 = vmatmul.mubr.f32.gmra.mrb[50].mxu0 %v1572_v1  ;;  %v4010_v1 = vpop.permute.xlu1 %1747 }
 0x3c1   :  { %1924 = vmatprep.mubr.f32.mxu0 %v1575_v25  ;;  %v4012_v25 = vpop.permute.xlu0 %1752 }
 0x3c4   :  { %1925 = vmatmul.mubr.f32.gmra.mrb[52].mxu0 %v1574_v5  ;;  %v4014_v5 = vpop.permute.xlu1 %1757 }
 0x3c5   :  { %1929 = vmatprep.mubr.f32.mxu0 %v1577_v37  ;;  %v4016_v37 = vpop.permute.xlu0 %1762 }
 0x3c8   :  { %1930 = vmatmul.mubr.f32.gmra.mrb[54].mxu0 %v1576_v47  ;;  %v4018_v47 = vpop.permute.xlu1 %1767 }
 0x3c9   :  { %1934 = vmatprep.mubr.f32.mxu0 %v1579_v22  ;;  %v4020_v22 = vpop.permute.xlu0 %1772 }
 0x3cc   :  { %1935 = vmatmul.mubr.f32.gmra.mrb[56].mxu0 %v1578_v48  ;;  %v4022_v48 = vpop.permute.xlu1 %1777 }
 0x3cd   :  { %1939 = vmatprep.mubr.f32.mxu0 %v1581_v51  ;;  %v4024_v51 = vpop.permute.xlu0 %1782 }
 0x3d0   :  { %1940 = vmatmul.mubr.f32.gmra.mrb[58].mxu0 %v1580_v52  ;;  %v4026_v52 = vpop.permute.xlu1 %1787 }
 0x3d1   :  { %1944 = vmatprep.mubr.f32.mxu0 %v1583_v40 }
 0x3d4   :  { %1945 = vmatmul.mubr.f32.gmra.mrb[60].mxu0 %v1582_v23 }
 0x3d5   :  { %1949 = vmatprep.mubr.f32.mxu0 %v1585_v54 }
 0x3d8   :  { %1950 = vmatmul.mubr.f32.gmra.mrb[62].mxu0 %v1584_v55  ;;  %v4028_v55 = vpop.permute.xlu0 %1792 }
 0x3d9   :  { %1954 = vmatprep.mubr.f32.mxu0 %v1587_v58 }
 0x3dc   :  { %1955 = vmatmul.mubr.f32.gmra.mrb[64].mxu0 %v1586_v3 }
 0x3dd   :  { %1959 = vmatprep.mubr.f32.mxu0 %v1589_v62 }
 0x3e0   :  { %1960 = vmatmul.mubr.f32.gmra.mrb[66].mxu0 %v1588_v63 }
 0x3e1   :  { %1964 = vmatprep.mubr.f32.mxu0 %v1591_v15  ;;  %v2102_v15 = vpop.permute.xlu1 %2101 }
 0x3e4   :  { %1965 = vmatmul.mubr.f32.gmra.mrb[68].mxu0 %v1590_v9 }
 0x3e5   :  { %1969 = vmatprep.mubr.f32.mxu0 %v1593_v2  ;;  %v2107_v2 = vpop.permute.xlu0 %2106 }
 0x3e8   :  { %1970 = vmatmul.mubr.f32.gmra.mrb[70].mxu0 %v1592_v6 }
 0x3e9   :  { %1974 = vmatprep.mubr.f32.mxu0 %v1595_v43 }
 0x3ec   :  { %1975 = vmatmul.mubr.f32.gmra.mrb[72].mxu0 %v1594_v8 }
 0x3ed   :  { %1979 = vmatprep.mubr.f32.mxu0 %v1597_v26 }
 0x3f0   :  { %1980 = vmatmul.mubr.f32.gmra.mrb[74].mxu0 %v1596_v20 }
 0x3f1   :  { %1984 = vmatprep.mubr.f32.mxu0 %v1599_v11 }
 0x3f4   :  { %1985 = vmatmul.mubr.f32.gmra.mrb[76].mxu0 %v1598_v12 }
 0x3f5   :  { %1989 = vmatprep.mubr.f32.mxu0 %v1601_v46  ;;  %v2112_v46 = vpop.permute.xlu1 %2111 }
 0x3f8   :  { %1990 = vmatmul.mubr.f32.gmra.mrb[78].mxu0 %v1600_v16 }
 0x3f9   :  { %1994 = vmatprep.mubr.f32.mxu0 %v1603_v31 }
 0x3fc   :  { %1995 = vmatmul.mubr.f32.gmra.mrb[80].mxu0 %v1602_v56 }
 0x3fd   :  { %1999 = vmatprep.mubr.f32.mxu0 %v1605_v59 }
 0x400   :  { %2000 = vmatmul.mubr.f32.gmra.mrb[82].mxu0 %v1604_v17 }
 0x401   :  { %2004 = vmatprep.mubr.f32.mxu0 %v1607_v60 }
 0x404   :  { %2005 = vmatmul.mubr.f32.gmra.mrb[84].mxu0 %v1606_v61  ;;  %v2117_v61 = vpop.permute.xlu0 %2116 }
 0x405   :  { %2009 = vmatprep.mubr.f32.mxu0 %v1609_v19 }
 0x408   :  { %2010 = vmatmul.mubr.f32.gmra.mrb[86].mxu0 %v1608_v21 }
 0x409   :  { %2014 = vmatprep.mubr.f32.mxu0 %v1611_v24 }
 0x40c   :  { %2015 = vmatmul.mubr.f32.gmra.mrb[88].mxu0 %v1610_v27 }
 0x40d   :  { %2019 = vmatprep.mubr.f32.mxu0 %v1613_v49 }
 0x410   :  { %2020 = vmatmul.mubr.f32.gmra.mrb[90].mxu0 %v1612_v14 }
 0x411   :  { %2024 = vmatprep.mubr.f32.mxu0 %v1615_v34  ;;  %v2122_v34 = vpop.permute.xlu1 %2121 }
 0x414   :  { %2025 = vmatmul.mubr.f32.gmra.mrb[92].mxu0 %v1614_v28 }
 0x415   :  { %2029 = vmatprep.mubr.f32.mxu0 %v1617_v29 }
 0x418   :  { %2030 = vmatmul.mubr.f32.gmra.mrb[94].mxu0 %v1616_v32 }
 0x46f   :  { %v1876_v40 = vpop.f32.mrb[32].mxu0 }
 0x470   :  { %v1877_v23 = vadd.f32 %v1876_v40, %v1653_v30  ;;  %v1878_v54 = vpop.f32.mrb[33].mxu0  ;;  %v2127_v40 = vpop.permute.xlu0 %2126 }
 0x472   :  { %v2035_v3 = vmax.f32 %v1877_v23, 0.0 }
 0x473   :  { %v1881_v58 = vpop.f32.mrb[34].mxu0 }
 0x474   :  { %v1882_v62 = vadd.f32 %v1881_v58, %v1658_v50  ;;  %v1883_v63 = vpop.f32.mrb[35].mxu0  ;;  %v2259_v43 = vmul.f32 %v2102_v15, %v2035_v3 }
 0x475   :  { %v2132_v63 = vpop.permute.xlu1 %2131 }
 0x476   :  { %v2036_v9 = vmax.f32 %v1882_v62, 0.0 }
 0x477   :  { %v1886_v6 = vpop.f32.mrb[36].mxu0 }
 0x478   :  { %v2260_v8 = vmul.f32 %v2107_v2, %v2036_v9  ;;  %v1887_v26 = vadd.f32 %v1886_v6, %v1663_v35  ;;  %v1888_v20 = vpop.f32.mrb[37].mxu0 }
 0x47a   :  { %v2291_v11 = vadd.f32 %v2260_v8, %v2259_v43  ;;  %v2037_v12 = vmax.f32 %v1887_v26, 0.0 }
 0x47b   :  { %v1891_v16 = vpop.f32.mrb[38].mxu0 }
 0x47c   :  { %v2261_v31 = vmul.f32 %v2112_v46, %v2037_v12  ;;  %v1892_v56 = vadd.f32 %v1891_v16, %v1668_v10  ;;  %v1893_v59 = vpop.f32.mrb[39].mxu0 }
 0x47e   :  { %v2292_v17 = vadd.f32 %v2291_v11, %v2261_v31  ;;  %v2038_v60 = vmax.f32 %v1892_v56, 0.0 }
 0x47f   :  { %v1896_v19 = vpop.f32.mrb[40].mxu0 }
 0x480   :  { %v2262_v21 = vmul.f32 %v2117_v61, %v2038_v60  ;;  %v1897_v24 = vadd.f32 %v1896_v19, %v1673_v18  ;;  %v1898_v27 = vpop.f32.mrb[41].mxu0 }
 0x482   :  { %v2293_v49 = vadd.f32 %v2292_v17, %v2262_v21  ;;  %v2039_v14 = vmax.f32 %v1897_v24, 0.0 }
 0x483   :  { %v1901_v28 = vpop.f32.mrb[42].mxu0 }
 0x484   :  { %v2263_v29 = vmul.f32 %v2122_v34, %v2039_v14  ;;  %v1902_v32 = vadd.f32 %v1901_v28, %v1678_v33  ;;  %v1903_v30 = vpop.f32.mrb[43].mxu0  ;;  %v2137_v33 = vpop.permute.xlu0 %2136 }
 0x486   :  { %v2294_v50 = vadd.f32 %v2293_v49, %v2263_v29  ;;  %v2040_v35 = vmax.f32 %v1902_v32, 0.0 }
 0x487   :  { %v1906_v23 = vpop.f32.mrb[44].mxu0 }
 0x488   :  { %v2264_v10 = vmul.f32 %v2127_v40, %v2040_v35  ;;  %v1907_v54 = vadd.f32 %v1906_v23, %v3984_v36  ;;  %v1908_v58 = vpop.f32.mrb[45].mxu0  ;;  %v2142_v36 = vpop.permute.xlu1 %2141 }
 0x48a   :  { %v2295_v3 = vadd.f32 %v2294_v50, %v2264_v10  ;;  %v2041_v62 = vmax.f32 %v1907_v54, 0.0 }
 0x48b   :  { %v1911_v18 = vpop.f32.mrb[46].mxu0 }
 0x48c   :  { %v2265_v15 = vmul.f32 %v2132_v63, %v2041_v62  ;;  %v1912_v9 = vadd.f32 %v1911_v18, %v3986_v39  ;;  %v1913_v2 = vpop.f32.mrb[47].mxu0  ;;  %v2147_v39 = vpop.permute.xlu0 %2146 }
 0x48e   :  { %v2296_v6 = vadd.f32 %v2295_v3, %v2265_v15  ;;  %v2042_v43 = vmax.f32 %v1912_v9, 0.0 }
 0x48f   :  { %v1916_v8 = vpop.f32.mrb[48].mxu0 }
 0x490   :  { %v2266_v26 = vmul.f32 %v2137_v33, %v2042_v43  ;;  %v1917_v20 = vadd.f32 %v1916_v8, %v3988_v4  ;;  %v1918_v11 = vpop.f32.mrb[49].mxu0  ;;  %v2152_v4 = vpop.permute.xlu1 %2151 }
 0x492   :  { %v2297_v12 = vadd.f32 %v2296_v6, %v2266_v26  ;;  %v2043_v46 = vmax.f32 %v1917_v20, 0.0 }
 0x493   :  { %v1921_v16 = vpop.f32.mrb[50].mxu0 }
 0x494   :  { %v2267_v31 = vmul.f32 %v2142_v36, %v2043_v46  ;;  %v1922_v56 = vadd.f32 %v1921_v16, %v3990_v0  ;;  %v1923_v59 = vpop.f32.mrb[51].mxu0  ;;  %v2157_v0 = vpop.permute.xlu0 %2156 }
 0x496   :  { %v2298_v17 = vadd.f32 %v2297_v12, %v2267_v31  ;;  %v2044_v60 = vmax.f32 %v1922_v56, 0.0 }
 0x497   :  { %v1926_v61 = vpop.f32.mrb[52].mxu0 }
 0x498   :  { %v2268_v19 = vmul.f32 %v2147_v39, %v2044_v60  ;;  %v1927_v21 = vadd.f32 %v1926_v61, %v3992_v42  ;;  %v1928_v24 = vpop.f32.mrb[53].mxu0  ;;  %v2162_v42 = vpop.permute.xlu1 %2161 }
 0x49a   :  { %v2299_v27 = vadd.f32 %v2298_v17, %v2268_v19  ;;  %v2045_v49 = vmax.f32 %v1927_v21, 0.0 }
 0x49b   :  { %v1931_v14 = vpop.f32.mrb[54].mxu0 }
 0x49c   :  { %v2269_v34 = vmul.f32 %v2152_v4, %v2045_v49  ;;  %v1932_v28 = vadd.f32 %v1931_v14, %v3994_v44  ;;  %v1933_v29 = vpop.f32.mrb[55].mxu0  ;;  %v2167_v44 = vpop.permute.xlu0 %2166 }
 0x49e   :  { %v2300_v32 = vadd.f32 %v2299_v27, %v2269_v34  ;;  %v2046_v30 = vmax.f32 %v1932_v28, 0.0 }
 0x49f   :  { %v1936_v50 = vpop.f32.mrb[56].mxu0 }
 0x4a0   :  { %v2270_v35 = vmul.f32 %v2157_v0, %v2046_v30  ;;  %v1937_v40 = vadd.f32 %v1936_v50, %v3996_v45  ;;  %v1938_v23 = vpop.f32.mrb[57].mxu0  ;;  %v2172_v45 = vpop.permute.xlu1 %2171 }
 0x4a2   :  { %v2301_v10 = vadd.f32 %v2300_v32, %v2270_v35  ;;  %v2047_v54 = vmax.f32 %v1937_v40, 0.0 }
 0x4a3   :  { %v1941_v58 = vpop.f32.mrb[58].mxu0 }
 0x4a4   :  { %v2271_v3 = vmul.f32 %v2162_v42, %v2047_v54  ;;  %v1942_v62 = vadd.f32 %v1941_v58, %v3998_v7  ;;  %v1943_v63 = vpop.f32.mrb[59].mxu0  ;;  %v2177_v7 = vpop.permute.xlu0 %2176 }
 0x4a6   :  { %v2302_v18 = vadd.f32 %v2301_v10, %v2271_v3  ;;  %v2048_v15 = vmax.f32 %v1942_v62, 0.0 }
 0x4a7   :  { %v1946_v9 = vpop.f32.mrb[60].mxu0 }
 0x4a8   :  { %v2272_v2 = vmul.f32 %v2167_v44, %v2048_v15  ;;  %v1947_v6 = vadd.f32 %v1946_v9, %v4000_v53  ;;  %v1948_v43 = vpop.f32.mrb[61].mxu0  ;;  %v2182_v53 = vpop.permute.xlu1 %2181 }
 0x4aa   :  { %v2303_v33 = vadd.f32 %v2302_v18, %v2272_v2  ;;  %v2049_v8 = vmax.f32 %v1947_v6, 0.0 }
 0x4ab   :  { %v1951_v26 = vpop.f32.mrb[62].mxu0 }
 0x4ac   :  { %v2273_v20 = vmul.f32 %v2172_v45, %v2049_v8  ;;  %v1952_v11 = vadd.f32 %v1951_v26, %v4002_v57  ;;  %v1953_v12 = vpop.f32.mrb[63].mxu0  ;;  %v2187_v57 = vpop.permute.xlu0 %2186 }
 0x4ae   :  { %v2304_v46 = vadd.f32 %v2303_v33, %v2273_v20  ;;  %v2050_v36 = vmax.f32 %v1952_v11, 0.0 }
 0x4af   :  { %v1956_v16 = vpop.f32.mrb[64].mxu0 }
 0x4b0   :  { %v2274_v31 = vmul.f32 %v2177_v7, %v2050_v36  ;;  %v1957_v56 = vadd.f32 %v1956_v16, %v4004_v38  ;;  %v1958_v59 = vpop.f32.mrb[65].mxu0  ;;  %v2192_v38 = vpop.permute.xlu1 %2191 }
 0x4b2   :  { %v2305_v17 = vadd.f32 %v2304_v46, %v2274_v31  ;;  %v2051_v60 = vmax.f32 %v1957_v56, 0.0 }
 0x4b3   :  { %v1961_v39 = vpop.f32.mrb[66].mxu0 }
 0x4b4   :  { %v2275_v61 = vmul.f32 %v2182_v53, %v2051_v60  ;;  %v1962_v19 = vadd.f32 %v1961_v39, %v4006_v13  ;;  %v1963_v21 = vpop.f32.mrb[67].mxu0  ;;  %v2197_v13 = vpop.permute.xlu0 %2196 }
 0x4b6   :  { %v2306_v24 = vadd.f32 %v2305_v17, %v2275_v61  ;;  %v2052_v27 = vmax.f32 %v1962_v19, 0.0 }
 0x4b7   :  { %v1966_v49 = vpop.f32.mrb[68].mxu0 }
 0x4b8   :  { %v2276_v4 = vmul.f32 %v2187_v57, %v2052_v27  ;;  %v1967_v14 = vadd.f32 %v1966_v49, %v4008_v41  ;;  %v1968_v34 = vpop.f32.mrb[69].mxu0  ;;  %v2202_v41 = vpop.permute.xlu1 %2201 }
 0x4ba   :  { %v2307_v28 = vadd.f32 %v2306_v24, %v2276_v4  ;;  %v2053_v29 = vmax.f32 %v1967_v14, 0.0 }
 0x4bb   :  { %v1971_v32 = vpop.f32.mrb[70].mxu0 }
 0x4bc   :  { %v2277_v30 = vmul.f32 %v2192_v38, %v2053_v29  ;;  %v1972_v0 = vadd.f32 %v1971_v32, %v4010_v1  ;;  %v1973_v50 = vpop.f32.mrb[71].mxu0  ;;  %v2207_v1 = vpop.permute.xlu0 %2206 }
 0x4bd   :  { %v2212_v8 = vpop.permute.xlu1 %2211 }
 0x4be   :  { %v2308_v35 = vadd.f32 %v2307_v28, %v2277_v30  ;;  %v2054_v40 = vmax.f32 %v1972_v0, 0.0 }
 0x4bf   :  { %v1976_v23 = vpop.f32.mrb[72].mxu0 }
 0x4c0   :  { %v2278_v10 = vmul.f32 %v2197_v13, %v2054_v40  ;;  %v1977_v54 = vadd.f32 %v1976_v23, %v4012_v25  ;;  %v1978_v42 = vpop.f32.mrb[73].mxu0  ;;  %v2217_v46 = vpop.permute.xlu0 %2216 }
 0x4c1   :  { %v2222_v7 = vpop.permute.xlu1 %2221 }
 0x4c2   :  { %v2309_v58 = vadd.f32 %v2308_v35, %v2278_v10  ;;  %v2055_v3 = vmax.f32 %v1977_v54, 0.0 }
 0x4c3   :  { %v1981_v62 = vpop.f32.mrb[74].mxu0 }
 0x4c4   :  { %v2279_v63 = vmul.f32 %v2202_v41, %v2055_v3  ;;  %v1982_v18 = vadd.f32 %v1981_v62, %v4014_v5  ;;  %v1983_v15 = vpop.f32.mrb[75].mxu0  ;;  %v2227_v60 = vpop.permute.xlu0 %2226 }
 0x4c5   :  { %v2232_v21 = vpop.permute.xlu1 %2231 }
 0x4c6   :  { %v2310_v44 = vadd.f32 %v2309_v58, %v2279_v63  ;;  %v2056_v9 = vmax.f32 %v1982_v18, 0.0 }
 0x4c7   :  { %v1986_v2 = vpop.f32.mrb[76].mxu0 }
 0x4c8   :  { %v2280_v6 = vmul.f32 %v2207_v1, %v2056_v9  ;;  %v1987_v43 = vadd.f32 %v1986_v2, %v4016_v37  ;;  %v1988_v33 = vpop.f32.mrb[77].mxu0  ;;  %v1798_v14 = vpop.permute.xlu0 %1797 }
 0x4c9   :  { %v2237_v28 = vpop.permute.xlu1 %2236 }
 0x4ca   :  { %v2311_v45 = vadd.f32 %v2310_v44, %v2280_v6  ;;  %v2057_v25 = vmax.f32 %v1987_v43, 0.0 }
 0x4cb   :  { %v1991_v26 = vpop.f32.mrb[78].mxu0 }
 0x4cc   :  { %v2281_v20 = vmul.f32 %v2212_v8, %v2057_v25  ;;  %v1992_v11 = vadd.f32 %v1991_v26, %v4018_v47  ;;  %v1993_v12 = vpop.f32.mrb[79].mxu0  ;;  %v1803_v50 = vpop.permute.xlu0 %1802 }
 0x4cd   :  { %v2242_v10 = vpop.permute.xlu1 %2241  ;;  %v2334_v12 = vlaneseq }
 0x4ce   :  { %v2312_v36 = vadd.f32 %v2311_v45, %v2281_v20  ;;  %v2058_v5 = vmax.f32 %v1992_v11, 0.0 }
 0x4cf   :  { %v1996_v16 = vpop.f32.mrb[80].mxu0 }
 0x4d0   :  { %v2282_v31 = vmul.f32 %v2217_v46, %v2058_v5  ;;  %v1997_v56 = vadd.f32 %v1996_v16, %v4020_v22  ;;  %v1998_v59 = vpop.f32.mrb[81].mxu0  ;;  %v1808_v62 = vpop.permute.xlu0 %1807  ;;  %v2335_v5 = vshrl.u32 %v2334_v12, 7 }
 0x4d2   :  { %v2313_v17 = vadd.f32 %v2312_v36, %v2282_v31  ;;  %v2059_v37 = vmax.f32 %v1997_v56, 0.0  ;;  %v2336_v31 = vsub.s32 0, %v2335_v5 }
 0x4d3   :  { %v2001_v53 = vpop.f32.mrb[82].mxu0 }
 0x4d4   :  { %v2283_v39 = vmul.f32 %v2222_v7, %v2059_v37  ;;  %v2002_v61 = vadd.f32 %v2001_v53, %v4022_v48  ;;  %v2003_v19 = vpop.f32.mrb[83].mxu0  ;;  %v2252_v43 = vpop.permute.xlu0 %2251 }
 0x4d6   :  { %v2314_v47 = vadd.f32 %v2313_v17, %v2283_v39  ;;  %v2060_v24 = vmax.f32 %v2002_v61, 0.0 }
 0x4d7   :  { %v2006_v27 = vpop.f32.mrb[84].mxu0 }
 0x4d8   :  { %v2284_v57 = vmul.f32 %v2227_v60, %v2060_v24  ;;  %v2007_v49 = vadd.f32 %v2006_v27, %v4024_v51  ;;  %v2008_v4 = vpop.f32.mrb[85].mxu0  ;;  %v2332_v59 = vpop.permute.xlu0 %2331 }
 0x4d9   :  { %v2337_v37 = vrot.slane %v2332_v59, %v2336_v31 }
 0x4da   :  { %v2315_v34 = vadd.f32 %v2314_v47, %v2284_v57  ;;  %v2061_v22 = vmax.f32 %v2007_v49, 0.0 }
 0x4db   :  { %v2011_v29 = vpop.f32.mrb[86].mxu0 }
 0x4dc   :  { %v2285_v38 = vmul.f32 %v2232_v21, %v2061_v22  ;;  %v2012_v32 = vadd.f32 %v2011_v29, %v4026_v52  ;;  %v2013_v30 = vpop.f32.mrb[87].mxu0  ;;  %v2247_v52 = vpop.permute.xlu1 %2246 }
 0x4de   :  { %v2316_v0 = vadd.f32 %v2315_v34, %v2285_v38  ;;  %v2062_v48 = vmax.f32 %v2012_v32, 0.0 }
 0x4df   :  { %v2016_v35 = vpop.f32.mrb[88].mxu0 }
 0x4e0   :  { %v2286_v40 = vmul.f32 %v2237_v28, %v2062_v48  ;;  %v2017_v13 = vadd.f32 %v2016_v35, %v4028_v55  ;;  %v2018_v23 = vpop.f32.mrb[89].mxu0  ;;  %v2257_v20 = vpop.permute.xlu1 %2256 }
 0x4e2   :  { %v2317_v51 = vadd.f32 %v2316_v0, %v2286_v40  ;;  %v2063_v54 = vmax.f32 %v2017_v13, 0.0 }
 0x4e3   :  { %v2021_v42 = vpop.f32.mrb[90].mxu0 }
 0x4e4   :  { %v2287_v58 = vmul.f32 %v2242_v10, %v2063_v54  ;;  %v2022_v3 = vadd.f32 %v2021_v42, %v1798_v14  ;;  %v2023_v41 = vpop.f32.mrb[91].mxu0 }
 0x4e6   :  { %v2318_v63 = vadd.f32 %v2317_v51, %v2287_v58  ;;  %v2064_v18 = vmax.f32 %v2022_v3, 0.0 }
 0x4e7   :  { %v2026_v15 = vpop.f32.mrb[92].mxu0 }
 0x4e8   :  { %v2288_v44 = vmul.f32 %v2247_v52, %v2064_v18  ;;  %v2027_v9 = vadd.f32 %v2026_v15, %v1803_v50  ;;  %v2028_v1 = vpop.f32.mrb[93].mxu0 }
 0x4ea   :  { %v2319_v2 = vadd.f32 %v2318_v63, %v2288_v44  ;;  %v2065_v6 = vmax.f32 %v2027_v9, 0.0 }
 0x4eb   :  { %v2031_v55 = vpop.f32.mrb[94].mxu0 }
 0x4ec   :  { %v2289_v33 = vmul.f32 %v2252_v43, %v2065_v6  ;;  %v2032_v8 = vadd.f32 %v2031_v55, %v1808_v62  ;;  %v2033_v45 = vpop.f32.mrb[95].mxu0 }
 0x4ee   :  { %v2320_v25 = vadd.f32 %v2319_v2, %v2289_v33  ;;  %v2066_v26 = vmax.f32 %v2032_v8, 0.0 }
 0x4f0   :  { %v2290_v11 = vmul.f32 %v2257_v20, %v2066_v26 }
 0x4f2   :  { %v2321_v46 = vadd.f32 %v2320_v25, %v2290_v11 }
 0x4f4   :  { %v2322_v36 = vrot.slane %v2321_v46, 4 }
 0x4f6   :  { %v2323_v7 = vadd.f32 %v2322_v36, %v2321_v46 }
 0x4f8   :  { %v2324_v16 = vrot.slane %v2323_v7, 2 }
 0x4fa   :  { %v2325_v56 = vadd.f32 %v2324_v16, %v2323_v7 }
 0x4fc   :  { %v2326_v17 = vrot.slane %v2325_v56, 1 }
 0x4fe   :  { %v2327_v60 = vadd.f32 %v2326_v17, %v2325_v56 }
 0x500   :  { %v2338_v53 = vadd.f32 %v2337_v37, %v2327_v60 }
 0x502   :  { %2339 = vst [vmem:[#allocation3] sm:$0x1] %v2338_v53 }
 0x503   :  { %2547 = shalt.err (!%p2544_p4)
}
 0x504   :  { %s2548_s21 = scalar_lea.hbm %s4076_s11, 16 }
 0x505   :  { %p2549_p5 = scmp.ne.s32.totalorder %s4076_s11, %s2548_s21  ;;  %p2552_p6 = scmp.lt.u32.totalorder %s2548_s21, %s4076_s11 }
 0x507   :  { %p2554_p7 = pnand %p2552_p6, %p2549_p5 }
 0x509   :  { %2557 = shalt.err (!%p2554_p7)
}
 0x50a   :  { %2349 = dma.vmem_to_hbm [thread:$0]  %s2347_s18, 16, %s4076_s11, [#allocation4]  }
 0x50b   :  { %2558 = dma.done.wait [#allocation4], 16  }
 0x50c   :  { %2559 = vsyncadd [#allocation4], 4294967280 }
 0x50d   :  { %2353 = vsyncpa [#allocation4], 1 }

</bundles_post_ra>
